<compile_context>
chip_gen: v5e
topology: v5e:2x2
jax: 0.10.0
libtpu: 0.0.40
codegen_flags: <defaults>
</compile_context>

<pallas_src>
import functools
import math

import jax
import jax.numpy as jnp
from jax.experimental import pallas as pl
from jax.experimental.pallas import tpu as pltpu


def _choose_tile(n, preferred, align):
    """Largest multiple of `align` that divides n and is <= max(preferred, align)."""
    assert n % align == 0, (n, align)
    t = max(align, min(preferred, n))
    t = (t // align) * align
    while n % t != 0:
        t -= align
    return t


# ---------------------------------------------------------------------------
# Kernel 1: fused QKV projection  y = x @ W_qkv + b_qkv
#   x:     [M, H]  bf16
#   W_qkv: [H, 3H] bf16   (concat of Wq^T | Wk^T | Wv^T, heads contiguous inside each)
#   b_qkv: [1, 3H] f32
#   out:   [M, 3H] bf16
# Full-H contraction inside one tile -> no accumulator scratch, no pl.when.
# ---------------------------------------------------------------------------
def _qkv_proj_kernel(x_ref, w_ref, b_ref, o_ref):
    acc = jnp.dot(x_ref[...], w_ref[...], preferred_element_type=jnp.float32)
    o_ref[...] = (acc + b_ref[...]).astype(o_ref.dtype)


def qkv_projection(x2d, w_qkv, b_qkv, *, tm=256, tn=512):
    M, H = x2d.shape
    Hw, N = w_qkv.shape
    assert H == Hw
    tm = _choose_tile(M, tm, 8)
    tn = _choose_tile(N, tn, 128)

    # double-buffered inputs/outputs + small margin, explicit budget (v7x safe)
    vmem_bytes = 2 * (tm * H * 2 + H * tn * 2 + tn * 4 + tm * tn * 2)
    vmem_limit = min(max(vmem_bytes + (8 << 20), 32 << 20), 64 << 20)

    grid = (M // tm, N // tn)
    return pl.pallas_call(
        _qkv_proj_kernel,
        out_shape=jax.ShapeDtypeStruct((M, N), jnp.bfloat16),
        grid_spec=pltpu.PrefetchScalarGridSpec(
            num_scalar_prefetch=0,
            grid=grid,
            in_specs=[
                pl.BlockSpec((tm, H), lambda i, j: (i, 0)),   # x row block (full H)
                pl.BlockSpec((H, tn), lambda i, j: (0, j)),   # weight column block
                pl.BlockSpec((1, tn), lambda i, j: (0, j)),   # bias slice
            ],
            out_specs=pl.BlockSpec((tm, tn), lambda i, j: (i, j)),
        ),
        compiler_params=pltpu.CompilerParams(
            dimension_semantics=("parallel", "parallel"),
            vmem_limit_bytes=vmem_limit,
        ),
    )(x2d, w_qkv, b_qkv)


# ---------------------------------------------------------------------------
# Kernel 2: flash-style masked attention, all heads of one batch per grid step
#   qkv : [B, S, 3H] bf16 (passed 3x with column-block 0/1/2 -> Q / K / V slabs)
#   mask: [B, S, S] int8 (nonzero = masked)
#   out : [B, S, H] bf16 (heads already merged -> no XLA transpose afterwards)
# Online softmax in f32, per-head running (max, denom) kept in a (tq, nh) scratch,
# context accumulated in a lane-dense (tq, H) scratch.
# ---------------------------------------------------------------------------
def _attn_kernel(q_ref, k_ref, v_ref, mask_ref, o_ref, m_sc, l_sc, acc_sc,
                 *, scale, num_heads, head_dim):
    kv = pl.program_id(2)

    @pl.when(kv == 0)
    def _init():
        m_sc[...] = jnp.full_like(m_sc, -jnp.inf)
        l_sc[...] = jnp.zeros_like(l_sc)
        acc_sc[...] = jnp.zeros_like(acc_sc)

    masked = mask_ref[0] != 0                       # (tq, tk) bool, shared by all heads

    for h in range(num_heads):                      # static unroll; nh is small
        lo = h * head_dim
        hi = lo + head_dim
        qh = q_ref[0, :, lo:hi]                     # (tq, D) bf16
        kh = k_ref[0, :, lo:hi]                     # (tk, D) bf16
        vh = v_ref[0, :, lo:hi]                     # (tk, D) bf16

        # scores = scale * (q @ k^T), f32 accumulation on the MXU
        s = jax.lax.dot_general(
            qh, kh, (((1,), (1,)), ((), ())), preferred_element_type=jnp.float32
        ) * scale
        # masked_fill(attention_mask, -10000.0)
        s = jnp.where(masked, -10000.0, s)

        m_prev = m_sc[:, h:h + 1]                   # (tq, 1)
        m_new = jnp.maximum(m_prev, s.max(axis=-1, keepdims=True))
        alpha = jnp.exp(m_prev - m_new)
        p = jnp.exp(s - m_new)                      # f32 unnormalized probs
        l_sc[:, h:h + 1] = alpha * l_sc[:, h:h + 1] + p.sum(axis=-1, keepdims=True)
        acc_sc[:, lo:hi] = alpha * acc_sc[:, lo:hi] + jnp.dot(
            p.astype(vh.dtype), vh, preferred_element_type=jnp.float32
        )
        m_sc[:, h:h + 1] = m_new

    @pl.when(kv == pl.num_programs(2) - 1)
    def _finish():
        inv_l = pl.reciprocal(l_sc[...], approx=True)           # (tq, nh)
        pieces = [
            acc_sc[:, h * head_dim:(h + 1) * head_dim] * inv_l[:, h:h + 1]
            for h in range(num_heads)
        ]
        # single lane-dense (tq, H) store
        o_ref[0] = jnp.concatenate(pieces, axis=-1).astype(o_ref.dtype)


def bert_self_attention(
    hidden_states,
    attention_mask,
    wq, bq, wk, bk, wv, bv,
    *,
    num_attention_heads,
    layer_number=1,
    scale_with_layer_number=False,
    tq=256,
    tk=512,
    proj_tm=256,
    proj_tn=512,
):
    """hidden_states: [B, S, H]; attention_mask: [B, 1, S, S] (True/nonzero = masked);
    wq/wk/wv: [H, H] PyTorch Linear layout (out, in); bq/bk/bv: [H]."""
    B, S, H = hidden_states.shape
    nh = num_attention_heads
    assert H % nh == 0
    D = H // nh
    assert H % 128 == 0, "hidden size must be a multiple of 128 (TPU lane tiling)"
    assert S % 128 == 0, "sequence length must be a multiple of 128"
    M = B * S

    scale = 1.0 / math.sqrt(D)
    if scale_with_layer_number:
        scale /= layer_number

    # ---- fused QKV projection (bf16 operands, f32 accumulate) ----
    # Output column layout: [Q head0..head{nh-1} | K heads | V heads]; per-head D-slices
    # are contiguous, so the attention kernel can slice heads directly (no transposes).
    x2d = hidden_states.reshape(M, H).astype(jnp.bfloat16)
    w_qkv = jnp.concatenate([wq.T, wk.T, wv.T], axis=1).astype(jnp.bfloat16)   # [H, 3H]
    b_qkv = jnp.concatenate([bq, bk, bv]).reshape(1, 3 * H).astype(jnp.float32)

    qkv = qkv_projection(x2d, w_qkv, b_qkv, tm=proj_tm, tn=proj_tn)            # [M, 3H]
    qkv = qkv.reshape(B, S, 3 * H)                                             # free reshape

    # mask -> int8 [B, S, S] (True/nonzero = masked); shared across heads.
    if attention_mask.ndim == 4:
        mask = jnp.broadcast_to(attention_mask, (B, 1, S, S)).reshape(B, S, S)
    else:
        mask = attention_mask.reshape(B, S, S)
    mask = (mask != 0).astype(jnp.int8)

    tq = _choose_tile(S, min(tq, S), 128)
    tk = _choose_tile(S, min(tk, S), 128)
    grid = (B, S // tq, S // tk)

    # explicit VMEM budget: double-buffered Q/K/V/mask/out blocks + scratch + margin
    vmem_bytes = (2 * (tq * H * 2 + 2 * (tk * H * 2) + tq * tk + tq * H * 2)
                  + tq * H * 4 + 2 * tq * max(nh, 128) * 4)
    vmem_limit = min(max(vmem_bytes + (8 << 20), 32 << 20), 64 << 20)

    ctx = pl.pallas_call(
        functools.partial(_attn_kernel, scale=scale, num_heads=nh, head_dim=D),
        out_shape=jax.ShapeDtypeStruct((B, S, H), jnp.bfloat16),
        grid_spec=pltpu.PrefetchScalarGridSpec(
            num_scalar_prefetch=0,
            grid=grid,
            in_specs=[
                pl.BlockSpec((1, tq, H), lambda b, qi, ki: (b, qi, 0)),    # Q columns
                pl.BlockSpec((1, tk, H), lambda b, qi, ki: (b, ki, 1)),    # K columns
                pl.BlockSpec((1, tk, H), lambda b, qi, ki: (b, ki, 2)),    # V columns
                pl.BlockSpec((1, tq, tk), lambda b, qi, ki: (b, qi, ki)),  # int8 mask
            ],
            out_specs=pl.BlockSpec((1, tq, H), lambda b, qi, ki: (b, qi, 0)),
            scratch_shapes=[
                pltpu.VMEM((tq, nh), jnp.float32),   # per-head running max
                pltpu.VMEM((tq, nh), jnp.float32),   # per-head running denom
                pltpu.VMEM((tq, H), jnp.float32),    # merged-head context accumulator
            ],
        ),
        compiler_params=pltpu.CompilerParams(
            dimension_semantics=("parallel", "parallel", "arbitrary"),
            vmem_limit_bytes=vmem_limit,
        ),
    )(qkv, qkv, qkv, mask)

    return ctx.astype(hidden_states.dtype)


# ---------------------------------------------------------------------------
# Pure-JAX f32 reference (module semantics).
# ---------------------------------------------------------------------------
def reference(x, mask4d, wq, bq, wk, bk, wv, bv, nh):
    B, S, H = x.shape
    D = H // nh
    xf = x.astype(jnp.float32)
    q = (xf @ wq.T + bq).reshape(B, S, nh, D).transpose(0, 2, 1, 3)
    k = (xf @ wk.T + bk).reshape(B, S, nh, D).transpose(0, 2, 1, 3)
    v = (xf @ wv.T + bv).reshape(B, S, nh, D).transpose(0, 2, 1, 3)
    s = jnp.einsum("bhqd,bhkd->bhqk", q, k) / math.sqrt(D)
    s = jnp.where(mask4d, -10000.0, s)
    p = jax.nn.softmax(s, axis=-1)
    ctx = jnp.einsum("bhqk,bhkd->bhqd", p, v)
    return ctx.transpose(0, 2, 1, 3).reshape(B, S, H).astype(x.dtype)


if __name__ == "__main__":
    # Small BERT-like config (TPU-tile friendly): batch=2, seq=256, hidden=256, heads=4.
    B, S, H, NH = 2, 256, 256, 4
    D = H // NH

    key = jax.random.PRNGKey(0)
    kx, kwq, kwk, kwv, kbq, kbk, kbv = jax.random.split(key, 7)

    bound = 1.0 / math.sqrt(H)
    wq = jax.random.uniform(kwq, (H, H), jnp.float32, -bound, bound)
    wk = jax.random.uniform(kwk, (H, H), jnp.float32, -bound, bound)
    wv = jax.random.uniform(kwv, (H, H), jnp.float32, -bound, bound)
    bq = jax.random.uniform(kbq, (H,), jnp.float32, -bound, bound)
    bk = jax.random.uniform(kbk, (H,), jnp.float32, -bound, bound)
    bv = jax.random.uniform(kbv, (H,), jnp.float32, -bound, bound)

    x = jax.random.normal(kx, (B, S, H), jnp.float32)

    # Padding mask (True = masked): batch 0 fully valid, batch 1 keys [S-64:) padded.
    lengths = jnp.array([S, S - 64])
    key_pos = jnp.arange(S)
    pad = key_pos[None, :] >= lengths[:, None]                  # [B, S]
    attention_mask = jnp.broadcast_to(pad[:, None, None, :], (B, 1, S, S))

    # Small tiles here so the multi-step online-softmax path is exercised (grid 2x2x2);
    # defaults (tq=256, tk=512) are the performance-tuned choice for realistic sizes.
    out = bert_self_attention(
        x, attention_mask, wq, bq, wk, bk, wv, bv,
        num_attention_heads=NH, tq=128, tk=128,
    )
    out = jax.block_until_ready(out)

    ref = reference(x, attention_mask, wq, bq, wk, bk, wv, bv, NH)

    assert out.shape == (B, S, H)
    max_err = float(jnp.max(jnp.abs(out - ref)))
    assert jnp.allclose(out, ref, atol=3e-2, rtol=3e-2), max_err

    print("KERNEL_OK")
</pallas_src>

<mosaic_0001>
module attributes {stable_mosaic.version = 11 : i64} {
  func.func @_qkv_proj_kernel(%arg0: i32, %arg1: i32, %arg2: memref<256x256xbf16, #tpu.memory_space<vmem>>, %arg3: memref<256x384xbf16, #tpu.memory_space<vmem>>, %arg4: memref<1x384xf32, #tpu.memory_space<vmem>>, %arg5: memref<256x384xbf16, #tpu.memory_space<vmem>>) attributes {dimension_semantics = [#tpu.dimension_semantics<parallel>, #tpu.dimension_semantics<parallel>], iteration_bounds = array<i64: 2, 2>, scalar_prefetch = 0 : i64, scratch_operands = 0 : i64, tpu.core_type = #tpu.core_type<tc>, window_params = [{transform_indices = @transform_0, window_bounds = array<i64: 256, 256>}, {transform_indices = @transform_1, window_bounds = array<i64: 256, 384>}, {transform_indices = @transform_2, window_bounds = array<i64: 1, 384>}, {transform_indices = @transform_3, window_bounds = array<i64: 256, 384>}]} {
    %c0 = arith.constant 0 : index
    %c0_0 = arith.constant 0 : index
    %0 = vector.load %arg2[%c0, %c0_0] : memref<256x256xbf16, #tpu.memory_space<vmem>>, vector<256x256xbf16>
    %c0_1 = arith.constant 0 : index
    %c0_2 = arith.constant 0 : index
    %1 = vector.load %arg3[%c0_1, %c0_2] : memref<256x384xbf16, #tpu.memory_space<vmem>>, vector<256x384xbf16>
    %cst = arith.constant dense<0.000000e+00> : vector<256x384xf32>
    %2 = tpu.matmul %0, %1, %cst {dimension_numbers = #tpu.dot_dimension_numbers<[1], [0], [0], [1], [0, 0, 1, 1], [], []>} : vector<256x256xbf16>, vector<256x384xbf16>, vector<256x384xf32> -> vector<256x384xf32>
    %c0_3 = arith.constant 0 : index
    %c0_4 = arith.constant 0 : index
    %3 = vector.load %arg4[%c0_3, %c0_4] : memref<1x384xf32, #tpu.memory_space<vmem>>, vector<1x384xf32>
    %4 = vector.broadcast %3 : vector<1x384xf32> to vector<256x384xf32>
    %5 = arith.addf %2, %4 : vector<256x384xf32>
    %6 = arith.truncf %5 : vector<256x384xf32> to vector<256x384xbf16>
    %c0_5 = arith.constant 0 : index
    %c0_6 = arith.constant 0 : index
    %7 = vector.load %arg5[%c0_5, %c0_6] : memref<256x384xbf16, #tpu.memory_space<vmem>>, vector<256x384xbf16>
    tpu.vector_store %arg5[%c0_5, %c0_6], %6 {strides = array<i32>} : memref<256x384xbf16, #tpu.memory_space<vmem>>, vector<256x384xbf16>,
    return
  }
  func.func @transform_0(%arg0: i32, %arg1: i32) -> (i32, i32) {
    %c0_i32 = arith.constant 0 : i32
    %c0_i32_0 = arith.constant 0 : i32
    return %arg0, %c0_i32 : i32, i32
  }
  func.func @transform_1(%arg0: i32, %arg1: i32) -> (i32, i32) {
    %c0_i32 = arith.constant 0 : i32
    %c0_i32_0 = arith.constant 0 : i32
    return %c0_i32, %arg1 : i32, i32
  }
  func.func @transform_2(%arg0: i32, %arg1: i32) -> (i32, i32) {
    %c0_i32 = arith.constant 0 : i32
    %c0_i32_0 = arith.constant 0 : i32
    return %c0_i32, %arg1 : i32, i32
  }
  func.func @transform_3(%arg0: i32, %arg1: i32) -> (i32, i32) {
    %c0_i32 = arith.constant 0 : i32
    return %arg0, %arg1 : i32, i32
  }
}

</mosaic_0001>

<bundles_post_ra>
// kernel: tpu_custom_call.1
= control target key start
LH: loop header
LB: loop body
LE: loop exit
PB: predicated region body
PF: predicated region fallthrough
CT: control target
= control target key end

     0   :  { %s3347_s0 = inlined_call_operand.hbm [shape: bf16[512,256], index: 0, kind: input, shape index: {}]   ;;  %s3348_s1 = inlined_call_operand.hbm [shape: bf16[256,768], index: 1, kind: input, shape index: {}]   ;;  %s3349_s2 = inlined_call_operand.hbm [shape: f32[1,768], index: 2, kind: input, shape index: {}]   ;;  %s3350_s3 = inlined_call_operand.hbm [shape: bf16[512,768], index: 3, kind: output, shape index: {}]  }
   0x1   :  { %3362 = sst [smem:[#allocation24_spill]] %s3347_s0 }
   0x2   :  { %3363 = sst [smem:[#allocation25_spill]] %s3348_s1 }
   0x3   :  { %3364 = sst [smem:[#allocation26_spill]] %s3350_s3 }
   0x4   :  { %8 = vsyncpa [#allocation3], 0 }
   0x5   :  { %10 = vsyncpa [#allocation3 + $0x1], 0 }
   0x6   :  { %11 = vsyncpa [#allocation6], 0 }
   0x7   :  { %13 = vsyncpa [#allocation6 + $0x1], 0 }
   0x8   :  { %14 = vsyncpa [#allocation4], 0 }
   0x9   :  { %16 = vsyncpa [#allocation4 + $0x1], 0  ;;  %s2475_s12 = smov 0   ;;  %s2477_s13 = smov 0  }
   0xa   :  { %s2479_s14 = smov 0   ;;  %s2481_s15 = smov 0  }
   0xb   :  { %s2483_s16 = smov 0   ;;  %s2485_s17 = smov 0  }
   0xc   :  { %s2487_s18 = smov 0   ;;  %s2489_s19 = smov 0  }
   0xd   :  { %s2491_s20 = smov 0   ;;  %s2493_s21 = smov 0  }
   0xe   :  { %s2495_s22 = smov 0   ;;  %s2497_s23 = smov 0  }
   0xf   :  { %s2499_s24 = smov 0   ;;  %s2501_s25 = smov 0  }
  0x10 LB: > { %3365 = sst [smem:[#allocation12_spill]] %s2393_s12  ;;  %s31_s26 = sadd.s32 1, %s2437_s23  ;;  %s2445_s25 = sphi %s2501_s25, %s22_s25   ;;  %s2441_s24 = sphi %s2499_s24, %s3401_s24   ;;  %s2437_s23 = sphi %s2497_s23, %s3410_s23   ;;  %s2433_s22 = sphi %s2495_s22, %s3399_s22   ;;  %s2429_s21 = sphi %s2493_s21, %s3409_s21   ;;  %s2425_s20 = sphi %s2491_s20, %s3398_s20   ;;  %s2421_s19 = sphi %s2489_s19, %s3408_s19   ;;  %s2417_s18 = sphi %s2487_s18, %s3407_s18   ;;  %s2413_s17 = sphi %s2485_s17, %s3406_s17   ;;  %s2409_s16 = sphi %s2483_s16, %s3405_s16   ;;  %s2405_s15 = sphi %s2481_s15, %s3404_s15   ;;  %s2401_s14 = sphi %s2479_s14, %s3395_s14   ;;  %s2397_s13 = sphi %s2477_s13, %s3403_s13   ;;  %s2393_s12 = sphi %s2475_s12, %s3402_s12  }
  0x11   : > { %3366 = sst [smem:[#allocation13_spill]] %s2401_s14  ;;  %p49_p0 = scmp.eq.s32.totalorder %s2445_s25, 0 }
  0x12   : > { %3367 = sst [smem:[#allocation14_spill]] %s2425_s20  ;;  %p74_p1 = scmp.ne.s32.totalorder %s2413_s17, %s2409_s16 }
  0x13   : > { %3368 = sst [smem:[#allocation15_spill]] %s2433_s22  ;;  %p80_p2 = scmp.ne.s32.totalorder %s2409_s16, %s2405_s15 }
  0x14   : > { %3369 = sst [smem:[#allocation16_spill]] %s2441_s24  ;;  %p76_p3 = por %p74_p1, %p49_p0 }
  0x15   : > { %p2083_p4 = scmp.lt.s32.totalorder %s2445_s25, 4  ;;  %s181_s28 = sand.u32 1, %s2445_s25  }
  0x16   : > { %s3351_s29 = sand.u32 1, %s2413_s17   ;;  %s1958_s4 = smul.u32 12, %s2437_s23 }
  0x17   : > { %s2055_s30 = smul.u32 384, %s3351_s29  ;;  %p2562_p5 = pnand %p2083_p4, %p76_p3 }
  0x18   : > { %s3371_s1 = sld [smem:[#allocation25_spill]]  ;;  %s2569_s29 = scalar_lea.sflag [#allocation6], %s181_s28 }
  0x19   : > { %s185_s9 = scalar_lea.vmem [#allocation5], %s2055_s30  ;;  %s2447_s6 = smov 384  }
  0x1a   : > { %s193_s10 = sshll.u32 %s185_s9, 4  ;;  %s2448_s7 = smov 192   ;;  %s194_s10 = int_to_ptr.vmem [resolvable:$true] %s193_s10 }
  0x1b   : > { %p1629_p6 = scmp.ge.s32.totalorder %s2445_s25, 1  ;;  %p220_p7 = scmp.lt.s32.totalorder %s2445_s25, 5 }
  0x1c   : > { %s1621_s28 = sadd.s32 4294967294, %s2445_s25   ;;  %p32_p9 = scmp.ge.s32.totalorder %s31_s26, 2 }
  0x1d   : > { %p2576_p8 = pnand %p1629_p6, %p220_p7  ;;  %s34_s9 = sadd.s32 1, %s2441_s24 }
  0x1e   : > { %s190_s8 = scalar_lea.hbm %s3371_s1, %s1958_s4  ;;  %s2449_s4 = smov 12  }
  0x1f   : > { %s191_s11 = sshll.u32 %s190_s8, 4  ;;  %s2581_s8 = sadd.s32 4294967295, %s2445_s25   ;;  %s192_s11 = int_to_ptr.hbm [resolvable:$true] %s191_s11 }
  0x20   : > { %2075 = dma.hbm_to_vmem [thread:$0]  (!%p2562_p5), %s192_s11, 6144, %s194_s10, %s2569_s29, %s2447_s6, %s2448_s7, %s2449_s4  }
  0x21   : > { %s41_s27 = sadd.s32 1, %s2425_s20  ;;  %s3412_s26 = smov (%p32_p9, %s31_s26), 0 }
  0x22   : > { %3373 = sst [smem:[#allocation17_spill]] %s3412_s26  ;;  %s3414_s9 = smov (!%p32_p9, %s34_s9), %s2441_s24 }
  0x23   : > { %p48_p10 = scmp.ne.s32.totalorder %s2425_s20, %s2421_s19  ;;  %p54_p11 = scmp.ne.s32.totalorder %s2421_s19, %s2417_s18 }
  0x24   : > { %p36_p12 = scmp.ge.s32.totalorder %s3414_s9, 2  ;;  %p55_p13 = scmp.eq.s32.totalorder %s2581_s8, 0 }
  0x25   : > { %p2600_p1 = por %p49_p0, %p48_p10  ;;  %s64_s11 = ssub.s32 %s2437_s23, %s3412_s26 }
  0x26   : > { %s3416_s9 = smov (%p36_p12, %s3414_s9), 0  ;;  %p2608_p3 = por %p55_p13, %p54_p11 }
  0x27   : > { %3375 = sst [smem:[#allocation18_spill]] %s3416_s9  ;;  %p65_p6 = scmp.eq.s32.totalorder %s64_s11, 0 }
  0x28   : > { %s38_s18 = ssub.s32 %s2441_s24, %s3416_s9  ;;  %p2617_p7 = por %p80_p2, %p55_p13 }
  0x29   : > { %p39_p0 = scmp.eq.s32.totalorder %s38_s18, 0  ;;  %s118_s4 = sor.u32 %s64_s11, %s38_s18 }
  0x2a   : > { %s3378_s1 = sadd.s32 1, %s2413_s17  ;;  %p119_p9 = scmp.eq.s32.totalorder %s118_s4, 0 }
  0x2b   : > { %s2624_s26 = scalar_select %p65_p6, %s2413_s17, %s3378_s1  }
  0x2c   : > { %s2627_s3 = scalar_select %p39_p0, %s2425_s20, %s41_s27  }
  0x2d   : > { %3379 = sst [smem:[#allocation19_spill]] %s2624_s26  ;;  %s121_s22 = sadd.s32 1, %s2401_s14 }
  0x2e   : > { %3380 = sst [smem:[#allocation20_spill]] %s2627_s3  ;;  %p131_p10 = scmp.ne.s32.totalorder %s2401_s14, %s2397_s13 }
  0x2f   : > { %p132_p11 = scmp.eq.s32.totalorder %s2581_s8, 3  ;;  %p137_p12 = scmp.ne.s32.totalorder %s2397_s13, %s2393_s12 }
  0x30   : > { %s2634_s9 = scalar_select %p119_p9, %s2401_s14, %s121_s22  }
  0x31   : > { %p2636_p2 = por %p132_p11, %p131_p10  ;;  %p138_p13 = scmp.eq.s32.totalorder %s1621_s28, 3 }
  0x32   : > { %3381 = sst [smem:[#allocation21_spill]] %s2634_s9  ;;  %s158_s11 = sand.u32 1, %s2425_s20  }
  0x33   : > { %s3382_s15 = scalar_select %p2636_p2, 1, 0 }
  0x34   : > { %s1624_s1 = sshll.u32 %s158_s11, 8  ;;  %p2643_p6 = por %p138_p13, %p137_p12 }
  0x35   : > { %3383 = sst [smem:[#allocation22_spill]] %s3382_s15  ;;  %s1957_s18 = sshll.u32 %s2441_s24, 8 }
  0x36   : > { %s3384_s27 = scalar_select %p2643_p6, 1, 0 }
  0x37   : > { %s162_s4 = scalar_lea.vmem [#allocation2], %s1624_s1  ;;  %s3386_s0 = sld [smem:[#allocation24_spill]] }
  0x38   : > { %3385 = sst [smem:[#allocation23_spill]] %s3384_s27  ;;  %s171_s3 = sshll.u32 %s162_s4, 4  ;;  %s172_s3 = int_to_ptr.vmem [resolvable:$true] %s171_s3 }
  0x39   : > { %p2070_p0 = pnand %p2083_p4, %p2600_p1  ;;  %s159_s28 = scalar_lea.sflag [#allocation3], %s158_s11 }
  0x3a   : > { %s2450_s20 = smov 128   ;;  %s2451_s12 = smov 8  }
  0x3b   : > { %s3387_s27 = sand.u32 1, %s2413_s17   ;;  %s208_s1 = smul.u32 3, %s2437_s23 }
  0x3c   : > { %s2056_s24 = smul.u32 3, %s3387_s27 }
  0x3d   : > { %s168_s9 = scalar_lea.hbm %s3386_s0, %s1957_s18  ;;  %s211_s26 = scalar_lea.hbm %s3349_s2, %s208_s1 }
  0x3e   : > { %s169_s14 = sshll.u32 %s168_s9, 4  ;;  %s207_s18 = scalar_lea.vmem [#allocation7], %s2056_s24  ;;  %s170_s14 = int_to_ptr.hbm [resolvable:$true] %s169_s14 }
  0x3f   : > { %2072 = dma.hbm_to_vmem [thread:$0]  (!%p2070_p0), %s170_s14, 4096, %s172_s3, %s159_s28, %s2450_s20, %s2450_s20, %s2451_s12  }
  0x40   : > { %s215_s22 = sshll.u32 %s207_s18, 4  ;;  %s213_s0 = sshll.u32 %s211_s26, 4  ;;  %s216_s22 = int_to_ptr.vmem [resolvable:$true] %s215_s22  ;;  %s214_s0 = int_to_ptr.hbm [resolvable:$true] %s213_s0 }
  0x41   : > { %2078 = dma.hbm_to_vmem [thread:$0]  (!%p2562_p5), %s214_s0, 48, %s216_s22, %s2569_s29  }
  0x42   : > { %224 = sbr.rel (%p2576_p8) target bundleno = 631 (0x277), region = 32  ;;  %s226_s3 = sand.u32 (!%p2576_p8), 1, %s2421_s19  }
  0x43   : > { %s1630_s12 = sshll.u32 (!%p2576_p8), %s226_s3, 8  ;;  %s227_s14 = scalar_lea.sflag (!%p2576_p8), [#allocation3], %s226_s3 }
  0x44   : > { %s2667_s20 = scalar_lea.vmem (!%p2576_p8), [#allocation2], %s1630_s12 }
  0x47   : > { %2380 = dma.done.wait (%p2608_p3), %s227_s14, 4096  }
  0x48   : > { %2382 = vsyncadd (%p2608_p3), %s227_s14, 4294963200  ;;  %s236_s0 = sand.u32 1, %s2581_s8   ;;  %s238_s24 = sand.u32 1, %s2409_s16  }
  0x49   : > { %s2057_s29 = smul.u32 384, %s238_s24  ;;  %s237_s5 = scalar_lea.sflag [#allocation6], %s236_s0 }
  0x4b   : > { %s2677_s30 = scalar_lea.vmem [#allocation5], %s2057_s29 }
  0x4c   : > { %2384 = dma.done.wait (%p2617_p7), %s237_s5, 6192  }
  0x4d   : > { %2386 = vsyncadd (%p2617_p7), %s237_s5, 4294961104  ;;  %v1845_v0 = vld [vmem:[%s2677_s30 + $0xa8] sm:$0xf]  ;;  %v2013_v1 = vld [vmem:[%s2677_s30 + $0xb0] sm:$0xf0]  ;;  %s2058_s8 = smul.u32 3, %s238_s24 }
  0x4e   : > { %v1941_v2 = vld [vmem:[%s2677_s30 + $0x168] sm:$0xf]  ;;  %v1846_v3 = vor.u32 %v2013_v1, %v1845_v0  ;;  %v2037_v4 = vld [vmem:[%s2677_s30 + $0x170] sm:$0xf0]  ;;  %v1833_v5 = vld [vmem:[%s2677_s30 + $0x90] sm:$0xf] }
  0x4f   : > { %v2010_v6 = vld [vmem:[%s2677_s30 + $0x98] sm:$0xf0]  ;;  %v1942_v7 = vor.u32 %v2037_v4, %v1941_v2  ;;  %v1929_v8 = vld [vmem:[%s2677_s30 + $0x150] sm:$0xf]  ;;  %v1821_v12 = vld [vmem:[%s2677_s30 + $0x78] sm:$0xf] }
  0x50   : > { %v2034_v9 = vld [vmem:[%s2677_s30 + $0x158] sm:$0xf0]  ;;  %809 = vmatpush.bf16.msra.mxu0 %v1846_v3  ;;  %2039 = vmatpush.bf16.msra.mxu2 %v1846_v3  ;;  %v1834_v10 = vor.u32 %v2010_v6, %v1833_v5  ;;  %v2007_v13 = vld [vmem:[%s2677_s30 + $0x80] sm:$0xf0]  ;;  %v1917_v14 = vld [vmem:[%s2677_s30 + $0x138] sm:$0xf] }
  0x51   : > { %898 = vmatpush.bf16.msra.mxu1 %v1942_v7  ;;  %2047 = vmatpush.bf16.msra.mxu3 %v1942_v7  ;;  %v1930_v11 = vor.u32 %v2034_v9, %v1929_v8  ;;  %v2031_v15 = vld [vmem:[%s2677_s30 + $0x140] sm:$0xf0]  ;;  %v1822_v16 = vor.u32 %v2007_v13, %v1821_v12  ;;  %v1809_v18 = vld [vmem:[%s2677_s30 + $0x60] sm:$0xf]  ;;  %v2004_v19 = vld [vmem:[%s2677_s30 + $0x68] sm:$0xf0] }
  0x52   : > { %v1918_v17 = vor.u32 %v2031_v15, %v1917_v14  ;;  %v1905_v20 = vld [vmem:[%s2677_s30 + $0x120] sm:$0xf]  ;;  %v2028_v21 = vld [vmem:[%s2677_s30 + $0x128] sm:$0xf0]  ;;  %v1810_v22 = vor.u32 %v2004_v19, %v1809_v18  ;;  %v1797_v24 = vld [vmem:[%s2677_s30 + $0x48] sm:$0xf] }
  0x53   : > { %v1906_v23 = vor.u32 %v2028_v21, %v1905_v20  ;;  %v2001_v25 = vld [vmem:[%s2677_s30 + $0x50] sm:$0xf0]  ;;  %v1893_v26 = vld [vmem:[%s2677_s30 + $0x108] sm:$0xf]  ;;  %v1785_v30 = vld [vmem:[%s2677_s30 + $0x30] sm:$0xf] }
  0x54   : > { %810 = vmatpush.bf16.msra.mxu0 %v1834_v10  ;;  %2040 = vmatpush.bf16.msra.mxu2 %v1834_v10  ;;  %v2025_v27 = vld [vmem:[%s2677_s30 + $0x110] sm:$0xf0]  ;;  %v1798_v28 = vor.u32 %v2001_v25, %v1797_v24  ;;  %v1998_v31 = vld [vmem:[%s2677_s30 + $0x38] sm:$0xf0]  ;;  %v1881_v32 = vld [vmem:[%s2677_s30 + $0xf0] sm:$0xf] }
  0x55   : > { %899 = vmatpush.bf16.msra.mxu1 %v1930_v11  ;;  %2048 = vmatpush.bf16.msra.mxu3 %v1930_v11  ;;  %v1894_v29 = vor.u32 %v2025_v27, %v1893_v26  ;;  %v2022_v33 = vld [vmem:[%s2677_s30 + $0xf8] sm:$0xf0]  ;;  %v1786_v34 = vor.u32 %v1998_v31, %v1785_v30  ;;  %v1773_v36 = vld [vmem:[%s2677_s30 + $0x18] sm:$0xf]  ;;  %v1995_v37 = vld [vmem:[%s2677_s30 + $0x20] sm:$0xf0] }
  0x56   : > { %v1882_v35 = vor.u32 %v2022_v33, %v1881_v32  ;;  %v1869_v38 = vld [vmem:[%s2677_s30 + $0xd8] sm:$0xf]  ;;  %v2019_v39 = vld [vmem:[%s2677_s30 + $0xe0] sm:$0xf0]  ;;  %v1774_v40 = vor.u32 %v1995_v37, %v1773_v36  ;;  %v1761_v41 = vld [vmem:[%s2677_s30] sm:$0xf] }
  0x57   : > { %v1870_v42 = vor.u32 %v2019_v39, %v1869_v38  ;;  %v1992_v43 = vld [vmem:[%s2677_s30 + $0x8] sm:$0xf0]  ;;  %v1857_v44 = vld [vmem:[%s2677_s30 + $0xc0] sm:$0xf]  ;;  %v1960_v47 = vld [vmem:[%s2667_s20 + $0x4] sm:$0xf0] }
  0x58   : > { %811 = vmatpush.bf16.msra.mxu0 %v1822_v16  ;;  %2041 = vmatpush.bf16.msra.mxu2 %v1822_v16  ;;  %v2016_v45 = vld [vmem:[%s2677_s30 + $0xc8] sm:$0xf0]  ;;  %v1633_v46 = vld [vmem:[%s2667_s20] sm:$0xf]  ;;  %v1976_v49 = vld [vmem:[%s2667_s20 + $0x84] sm:$0xf0]  ;;  %v1762_v54 = vor.u32 %v1992_v43, %v1761_v41 }
  0x59   : > { %900 = vmatpush.bf16.msra.mxu1 %v1918_v17  ;;  %2049 = vmatpush.bf16.msra.mxu3 %v1918_v17  ;;  %v1697_v48 = vld [vmem:[%s2667_s20 + $0x80] sm:$0xf]  ;;  %v2012_v50 = vld [vmem:[%s2677_s30 + $0xac] sm:$0xf]  ;;  %v1847_v51 = vld [vmem:[%s2677_s30 + $0xb4] sm:$0xf0]  ;;  %v1858_v58 = vor.u32 %v2016_v45, %v1857_v44  ;;  %v2732_v3 = vor.u32 %v1960_v47, %v1633_v46 }
  0x5a   : > { %v2036_v52 = vld [vmem:[%s2677_s30 + $0x16c] sm:$0xf]  ;;  %v1943_v53 = vld [vmem:[%s2677_s30 + $0x174] sm:$0xf0]  ;;  %v1959_v55 = vld [vmem:[%s2667_s20 + $0x4] sm:$0xf]  ;;  %v1850_v62 = vor.u32 %v2012_v50, %v1847_v51  ;;  %v2734_v4 = vor.u32 %v1976_v49, %v1697_v48 }
  0x5b   : > { %v1635_v56 = vld [vmem:[%s2667_s20 + $0x8] sm:$0xf0]  ;;  %v1975_v57 = vld [vmem:[%s2667_s20 + $0x84] sm:$0xf]  ;;  %v1853_v60 = vld [vmem:[%s2677_s30 + $0xb0] sm:$0xf]  ;;  %v1946_v63 = vor.u32 %v2036_v52, %v1943_v53 }
  0x5c   : > { %812 = vmatpush.bf16.msra.mxu0 %v1810_v22  ;;  %2042 = vmatpush.bf16.msra.mxu2 %v1810_v22  ;;  %v1699_v59 = vld [vmem:[%s2667_s20 + $0x88] sm:$0xf0]  ;;  %v2014_v61 = vld [vmem:[%s2677_s30 + $0xb8] sm:$0xf0]  ;;  %v1949_v0 = vld [vmem:[%s2677_s30 + $0x170] sm:$0xf]  ;;  %v2739_v8 = vor.u32 %v1959_v55, %v1635_v56 }
  0x5d   : > { %901 = vmatpush.bf16.msra.mxu1 %v1906_v23  ;;  %2050 = vmatpush.bf16.msra.mxu3 %v1906_v23  ;;  %v2038_v1 = vld [vmem:[%s2677_s30 + $0x178] sm:$0xf0]  ;;  %v2009_v2 = vld [vmem:[%s2677_s30 + $0x94] sm:$0xf]  ;;  %v1835_v5 = vld [vmem:[%s2677_s30 + $0x9c] sm:$0xf0]  ;;  %v2741_v9 = vor.u32 %v1975_v57, %v1699_v59  ;;  %v1854_v10 = vor.u32 %v2014_v61, %v1853_v60 }
  0x5e   : > { %v2033_v6 = vld [vmem:[%s2677_s30 + $0x154] sm:$0xf]  ;;  %v1931_v7 = vld [vmem:[%s2677_s30 + $0x15c] sm:$0xf0]  ;;  %v1950_v11 = vor.u32 %v2038_v1, %v1949_v0  ;;  %v1841_v12 = vld [vmem:[%s2677_s30 + $0x98] sm:$0xf]  ;;  %v1838_v13 = vor.u32 %v2009_v2, %v1835_v5 }
  0x5f   : > { %v1934_v14 = vor.u32 %v2033_v6, %v1931_v7  ;;  %v2011_v15 = vld [vmem:[%s2677_s30 + $0xa0] sm:$0xf0]  ;;  %v1937_v16 = vld [vmem:[%s2677_s30 + $0x158] sm:$0xf]  ;;  %v2006_v18 = vld [vmem:[%s2677_s30 + $0x7c] sm:$0xf] }
  0x60   : > { %813 = vmatpush.bf16.msra.mxu0 %v1798_v28  ;;  %2043 = vmatpush.bf16.msra.mxu2 %v1798_v28  ;;  %v2035_v17 = vld [vmem:[%s2677_s30 + $0x160] sm:$0xf0]  ;;  %v1823_v19 = vld [vmem:[%s2677_s30 + $0x84] sm:$0xf0]  ;;  %v2030_v20 = vld [vmem:[%s2677_s30 + $0x13c] sm:$0xf]  ;;  %v1842_v21 = vor.u32 %v2011_v15, %v1841_v12 }
  0x61   : > { %902 = vmatpush.bf16.msra.mxu1 %v1894_v29  ;;  %2051 = vmatpush.bf16.msra.mxu3 %v1894_v29  ;;  %v1938_v22 = vor.u32 %v2035_v17, %v1937_v16  ;;  %v1919_v23 = vld [vmem:[%s2677_s30 + $0x144] sm:$0xf0]  ;;  %v1829_v24 = vld [vmem:[%s2677_s30 + $0x80] sm:$0xf]  ;;  %v1826_v25 = vor.u32 %v2006_v18, %v1823_v19  ;;  %v2008_v27 = vld [vmem:[%s2677_s30 + $0x88] sm:$0xf0] }
  0x62   : > { %v1922_v26 = vor.u32 %v2030_v20, %v1919_v23  ;;  %v1925_v28 = vld [vmem:[%s2677_s30 + $0x140] sm:$0xf]  ;;  %v2032_v29 = vld [vmem:[%s2677_s30 + $0x148] sm:$0xf0]  ;;  %v1830_v30 = vor.u32 %v2008_v27, %v1829_v24  ;;  %v1641_v32 = vld [vmem:[%s2667_s20 + $0x10] sm:$0xf] }
  0x63   : > { %v1926_v31 = vor.u32 %v2032_v29, %v1925_v28  ;;  %v1962_v33 = vld [vmem:[%s2667_s20 + $0x14] sm:$0xf0]  ;;  %v1961_v36 = vld [vmem:[%s2667_s20 + $0x14] sm:$0xf]  ;;  %v1643_v37 = vld [vmem:[%s2667_s20 + $0x18] sm:$0xf0] }
  0x64   : > { %814 = vmatpush.bf16.msra.mxu0 %v1786_v34  ;;  %2044 = vmatpush.bf16.msra.mxu2 %v1786_v34  ;;  %v1705_v34 = vld [vmem:[%s2667_s20 + $0x90] sm:$0xf]  ;;  %v1977_v38 = vld [vmem:[%s2667_s20 + $0x94] sm:$0xf]  ;;  %v1707_v39 = vld [vmem:[%s2667_s20 + $0x98] sm:$0xf0] }
  0x65   : > { %903 = vmatpush.bf16.msra.mxu1 %v1882_v35  ;;  %2052 = vmatpush.bf16.msra.mxu3 %v1882_v35  ;;  %v1978_v35 = vld [vmem:[%s2667_s20 + $0x94] sm:$0xf0]  ;;  %v2773_v43 = vor.u32 %v1977_v38, %v1707_v39  ;;  %v2003_v44 = vld [vmem:[%s2677_s30 + $0x64] sm:$0xf]  ;;  %v1811_v45 = vld [vmem:[%s2677_s30 + $0x6c] sm:$0xf0] }
  0x66   : > { %v2769_v41 = vor.u32 %v1978_v35, %v1705_v34  ;;  %v2027_v46 = vld [vmem:[%s2677_s30 + $0x124] sm:$0xf]  ;;  %v1814_v47 = vor.u32 %v2003_v44, %v1811_v45  ;;  %v1907_v48 = vld [vmem:[%s2677_s30 + $0x12c] sm:$0xf0]  ;;  %v1817_v49 = vld [vmem:[%s2677_s30 + $0x68] sm:$0xf] }
  0x67   : > { %v2005_v50 = vld [vmem:[%s2677_s30 + $0x70] sm:$0xf0]  ;;  %v1910_v51 = vor.u32 %v2027_v46, %v1907_v48  ;;  %v1913_v53 = vld [vmem:[%s2677_s30 + $0x128] sm:$0xf]  ;;  %v1649_v56 = vld [vmem:[%s2667_s20 + $0x20] sm:$0xf] }
  0x68   : > { %815 = vmatpush.bf16.msra.mxu0 %v1774_v40  ;;  %2045 = vmatpush.bf16.msra.mxu2 %v1774_v40  ;;  %v2767_v40 = vor.u32 %v1962_v33, %v1641_v32  ;;  %v1818_v52 = vor.u32 %v2005_v50, %v1817_v49  ;;  %v1964_v57 = vld [vmem:[%s2667_s20 + $0x24] sm:$0xf0]  ;;  %v1963_v60 = vld [vmem:[%s2667_s20 + $0x24] sm:$0xf]  ;;  %v1651_v61 = vld [vmem:[%s2667_s20 + $0x28] sm:$0xf0] }
  0x69   : > { %904 = vmatpush.bf16.msra.mxu1 %v1870_v42  ;;  %2053 = vmatpush.bf16.msra.mxu3 %v1870_v42  ;;  %v2771_v42 = vor.u32 %v1961_v36, %v1643_v37  ;;  %v1980_v59 = vld [vmem:[%s2667_s20 + $0xa4] sm:$0xf0]  ;;  %v2795_v0 = vor.u32 %v1964_v57, %v1649_v56  ;;  %v2799_v2 = vor.u32 %v1963_v60, %v1651_v61  ;;  %v2000_v6 = vld [vmem:[%s2677_s30 + $0x4c] sm:$0xf]  ;;  %v1799_v7 = vld [vmem:[%s2677_s30 + $0x54] sm:$0xf0] }
  0x6a   : > { %v1895_v12 = vld [vmem:[%s2677_s30 + $0x114] sm:$0xf0]  ;;  %v1901_v17 = vld [vmem:[%s2677_s30 + $0x110] sm:$0xf]  ;;  %v2026_v18 = vld [vmem:[%s2677_s30 + $0x118] sm:$0xf0] }
  0x6b   : > { %v1902_v19 = vor.u32 %v2026_v18, %v1901_v17  ;;  %v1657_v20 = vld [vmem:[%s2667_s20 + $0x30] sm:$0xf]  ;;  %v1982_v23 = vld [vmem:[%s2667_s20 + $0xb4] sm:$0xf0]  ;;  %v1965_v24 = vld [vmem:[%s2667_s20 + $0x34] sm:$0xf] }
  0x6c   : > { %816 = vmatpush.bf16.msra.mxu0 %v1762_v54  ;;  %2046 = vmatpush.bf16.msra.mxu2 %v1762_v54  ;;  %v2029_v54 = vld [vmem:[%s2677_s30 + $0x130] sm:$0xf0]  ;;  %v1723_v27 = vld [vmem:[%s2667_s20 + $0xb8] sm:$0xf0]  ;;  %v1787_v33 = vld [vmem:[%s2677_s30 + $0x3c] sm:$0xf0] }
  0x6d   : > { %905 = vmatpush.bf16.msra.mxu1 %v1858_v58  ;;  %2054 = vmatpush.bf16.msra.mxu3 %v1858_v58  ;;  %v1914_v55 = vor.u32 %v2029_v54, %v1913_v53  ;;  %v1713_v58 = vld [vmem:[%s2667_s20 + $0xa0] sm:$0xf]  ;;  %v1997_v32 = vld [vmem:[%s2677_s30 + $0x34] sm:$0xf]  ;;  %v1793_v37 = vld [vmem:[%s2677_s30 + $0x38] sm:$0xf] }
  0x6e   : > { %v2797_v1 = vor.u32 %v1980_v59, %v1713_v58  ;;  %v2021_v34 = vld [vmem:[%s2677_s30 + $0xf4] sm:$0xf]  ;;  %v1790_v35 = vor.u32 %v1997_v32, %v1787_v33  ;;  %v1883_v36 = vld [vmem:[%s2677_s30 + $0xfc] sm:$0xf0]  ;;  %v1999_v38 = vld [vmem:[%s2677_s30 + $0x40] sm:$0xf0] }
  0x6f   : > { %817 = vmatmul.bf16.vlgmr.msra.gmra.mxu0 %v2732_v3  ;;  %857 = vmatmul.bf16.vlgmr.msra.gmra.mxu2 %v2734_v4  ;;  %v1886_v39 = vor.u32 %v2021_v34, %v1883_v36  ;;  %v1794_v44 = vor.u32 %v1999_v38, %v1793_v37  ;;  %v1889_v45 = vld [vmem:[%s2677_s30 + $0xf8] sm:$0xf]  ;;  %v2023_v46 = vld [vmem:[%s2677_s30 + $0x100] sm:$0xf0]  ;;  %v1665_v48 = vld [vmem:[%s2667_s20 + $0x40] sm:$0xf] }
  0x70   : > { %987 = vmatpush.bf16.msrb.mxu2 %v1850_v62  ;;  %906 = vmatmul.bf16.vlgmr.msra.gmra.mxu1 %v2739_v8  ;;  %v1979_v62 = vld [vmem:[%s2667_s20 + $0xa4] sm:$0xf]  ;;  %v1968_v49 = vld [vmem:[%s2667_s20 + $0x44] sm:$0xf0]  ;;  %v1729_v50 = vld [vmem:[%s2667_s20 + $0xc0] sm:$0xf] }
  0x71   : > { %1076 = vmatpush.bf16.msrb.mxu3 %v1946_v63  ;;  %1165 = vmatpush.bf16.msrb.mxu0 %v1854_v10  ;;  %v1715_v63 = vld [vmem:[%s2667_s20 + $0xa8] sm:$0xf0]  ;;  %v1983_v54 = vld [vmem:[%s2667_s20 + $0xc4] sm:$0xf]  ;;  %v2851_v56 = vor.u32 %v1968_v49, %v1665_v48  ;;  %v1994_v60 = vld [vmem:[%s2677_s30 + $0x1c] sm:$0xf] }
  0x72   : > { %946 = vmatmul.bf16.vlgmr.msra.gmra.mxu3 %v2741_v9  ;;  %1254 = vmatpush.bf16.msrb.mxu1 %v1950_v11  ;;  %v2801_v5 = vor.u32 %v1979_v62, %v1715_v63  ;;  %v2024_v10 = vld [vmem:[%s2677_s30 + $0x10c] sm:$0xf]  ;;  %v1802_v11 = vor.u32 %v2000_v6, %v1799_v7  ;;  %v1775_v61 = vld [vmem:[%s2677_s30 + $0x24] sm:$0xf0]  ;;  %v2018_v62 = vld [vmem:[%s2677_s30 + $0xdc] sm:$0xf] }
  0x73   : > { %v1898_v15 = vor.u32 %v2024_v10, %v1895_v12  ;;  %v1667_v53 = vld [vmem:[%s2667_s20 + $0x48] sm:$0xf0]  ;;  %v1778_v63 = vor.u32 %v1994_v60, %v1775_v61  ;;  %v1871_v6 = vld [vmem:[%s2677_s30 + $0xe4] sm:$0xf0]  ;;  %v1781_v7 = vld [vmem:[%s2677_s30 + $0x20] sm:$0xf] }
  0x74   : > { %988 = vmatpush.bf16.msrb.mxu2 %v1838_v13  ;;  %v1805_v13 = vld [vmem:[%s2677_s30 + $0x50] sm:$0xf]  ;;  %v1996_v10 = vld [vmem:[%s2677_s30 + $0x28] sm:$0xf0]  ;;  %v1970_v17 = vld [vmem:[%s2667_s20 + $0x54] sm:$0xf0] }
  0x75   : > { %1077 = vmatpush.bf16.msrb.mxu3 %v1934_v14  ;;  %1166 = vmatpush.bf16.msrb.mxu0 %v1842_v21  ;;  %v2002_v14 = vld [vmem:[%s2677_s30 + $0x58] sm:$0xf0]  ;;  %v1966_v21 = vld [vmem:[%s2667_s20 + $0x34] sm:$0xf0]  ;;  %v1782_v12 = vor.u32 %v1996_v10, %v1781_v7  ;;  %v1737_v18 = vld [vmem:[%s2667_s20 + $0xd0] sm:$0xf] }
  0x76   : > { %1255 = vmatpush.bf16.msrb.mxu1 %v1938_v22  ;;  %v1806_v16 = vor.u32 %v2002_v14, %v1805_v13  ;;  %v1721_v22 = vld [vmem:[%s2667_s20 + $0xb0] sm:$0xf]  ;;  %v2823_v28 = vor.u32 %v1966_v21, %v1657_v20  ;;  %v1877_v13 = vld [vmem:[%s2677_s30 + $0xe0] sm:$0xf]  ;;  %v2020_v14 = vld [vmem:[%s2677_s30 + $0xe8] sm:$0xf0] }
  0x77   : > { %v2825_v29 = vor.u32 %v1982_v23, %v1721_v22  ;;  %v1969_v20 = vld [vmem:[%s2667_s20 + $0x54] sm:$0xf]  ;;  %v1675_v21 = vld [vmem:[%s2667_s20 + $0x58] sm:$0xf0]  ;;  %v1991_v32 = vld [vmem:[%s2677_s30 + $0x4] sm:$0xf] }
  0x78   : > { %989 = vmatpush.bf16.msrb.mxu2 %v1826_v25  ;;  %v1659_v25 = vld [vmem:[%s2667_s20 + $0x38] sm:$0xf0]  ;;  %v1985_v22 = vld [vmem:[%s2667_s20 + $0xd4] sm:$0xf]  ;;  %v1763_v33 = vld [vmem:[%s2677_s30 + $0xc] sm:$0xf0] }
  0x79   : > { %1078 = vmatpush.bf16.msrb.mxu3 %v1922_v26  ;;  %1167 = vmatpush.bf16.msrb.mxu0 %v1830_v30  ;;  %v1981_v26 = vld [vmem:[%s2667_s20 + $0xb4] sm:$0xf]  ;;  %v2827_v30 = vor.u32 %v1965_v24, %v1659_v25  ;;  %v1739_v23 = vld [vmem:[%s2667_s20 + $0xd8] sm:$0xf0]  ;;  %v2015_v34 = vld [vmem:[%s2677_s30 + $0xc4] sm:$0xf] }
  0x7a   : > { %1256 = vmatpush.bf16.msrb.mxu1 %v1926_v31  ;;  %v2829_v31 = vor.u32 %v1981_v26, %v1723_v27  ;;  %v2883_v26 = vor.u32 %v1969_v20, %v1675_v21  ;;  %v2885_v27 = vor.u32 %v1985_v22, %v1739_v23  ;;  %v1859_v36 = vld [vmem:[%s2677_s30 + $0xcc] sm:$0xf0]  ;;  %v1769_v37 = vld [vmem:[%s2677_s30 + $0x8] sm:$0xf]  ;;  %v1993_v38 = vld [vmem:[%s2677_s30 + $0x10] sm:$0xf0] }
  0x7b   : > { %v1681_v48 = vld [vmem:[%s2667_s20 + $0x60] sm:$0xf]  ;;  %v1972_v49 = vld [vmem:[%s2667_s20 + $0x64] sm:$0xf0]  ;;  %v1974_v7 = vld [vmem:[%s2667_s20 + $0x74] sm:$0xf0] }
  0x7c   : > { %990 = vmatpush.bf16.msrb.mxu2 %v1814_v47  ;;  %v1890_v47 = vor.u32 %v2023_v46, %v1889_v45  ;;  %v1865_v45 = vld [vmem:[%s2677_s30 + $0xc8] sm:$0xf]  ;;  %v2017_v46 = vld [vmem:[%s2677_s30 + $0xd0] sm:$0xf0]  ;;  %v2907_v60 = vor.u32 %v1972_v49, %v1681_v48  ;;  %v1753_v10 = vld [vmem:[%s2667_s20 + $0xf0] sm:$0xf] }
  0x7d   : > { %1079 = vmatpush.bf16.msrb.mxu3 %v1910_v51  ;;  %1168 = vmatpush.bf16.msrb.mxu0 %v1818_v52  ;;  %v1984_v51 = vld [vmem:[%s2667_s20 + $0xc4] sm:$0xf0]  ;;  %v1967_v52 = vld [vmem:[%s2667_s20 + $0x44] sm:$0xf]  ;;  %s250_s9 = scalar_lea.vmem [#allocation7], %s2058_s8  ;;  %s281_s10 = sand.u32 1, %s2397_s13  }
  0x7e   : > { %1257 = vmatpush.bf16.msrb.mxu1 %v1914_v55  ;;  %v1731_v55 = vld [vmem:[%s2667_s20 + $0xc8] sm:$0xf0]  ;;  %v2853_v57 = vor.u32 %v1984_v51, %v1729_v50  ;;  %v2855_v58 = vor.u32 %v1967_v52, %v1667_v53  ;;  %v1745_v50 = vld [vmem:[%s2667_s20 + $0xe0] sm:$0xf]  ;;  %v1988_v51 = vld [vmem:[%s2667_s20 + $0xe4] sm:$0xf0] }
  0x7f   : > { %822 = vmatmul.bf16.gmra.mxu0 %v2767_v40  ;;  %862 = vmatmul.bf16.gmra.mxu2 %v2769_v41  ;;  %v2857_v59 = vor.u32 %v1983_v54, %v1731_v55  ;;  %v1971_v52 = vld [vmem:[%s2667_s20 + $0x64] sm:$0xf]  ;;  %v1683_v53 = vld [vmem:[%s2667_s20 + $0x68] sm:$0xf0]  ;;  %v2909_v61 = vor.u32 %v1988_v51, %v1745_v50  ;;  %s2059_s6 = smul.u32 384, %s281_s10  ;;  %s3388_s15 = sld [smem:[#allocation15_spill]] }
  0x80   : > { %911 = vmatmul.bf16.gmra.mxu1 %v2771_v42  ;;  %991 = vmatpush.bf16.msrb.mxu2 %v1802_v11  ;;  %v1874_v11 = vor.u32 %v2018_v62, %v1871_v6  ;;  %v1987_v54 = vld [vmem:[%s2667_s20 + $0xe4] sm:$0xf]  ;;  %v1747_v55 = vld [vmem:[%s2667_s20 + $0xe8] sm:$0xf0]  ;;  %v2911_v62 = vor.u32 %v1971_v52, %v1683_v53  ;;  %v1689_v6 = vld [vmem:[%s2667_s20 + $0x70] sm:$0xf] }
  0x81   : > { %1080 = vmatpush.bf16.msrb.mxu3 %v1898_v15  ;;  %1169 = vmatpush.bf16.msrb.mxu0 %v1806_v16  ;;  %v1878_v15 = vor.u32 %v2020_v14, %v1877_v13  ;;  %v1673_v16 = vld [vmem:[%s2667_s20 + $0x50] sm:$0xf]  ;;  %v1691_v13 = vld [vmem:[%s2667_s20 + $0x78] sm:$0xf0]  ;;  %v1989_v14 = vld [vmem:[%s2667_s20 + $0xf4] sm:$0xf] }
  0x82   : > { %951 = vmatmul.bf16.gmra.mxu3 %v2773_v43  ;;  %1258 = vmatpush.bf16.msrb.mxu1 %v1902_v19  ;;  %v1986_v19 = vld [vmem:[%s2667_s20 + $0xd4] sm:$0xf0]  ;;  %v2879_v24 = vor.u32 %v1970_v17, %v1673_v16  ;;  %v2927_v16 = vor.u32 %v1974_v7, %v1689_v6  ;;  %v2941_v20 = vld [vmem:[%s250_s9] sm:$0x7]  ;;  %s3088_s7 = scalar_lea.vmem [#allocation8], %s2059_s6  ;;  %s1480_s11 = smul.u32 3, %s2429_s21 }
  0x83   : > { %v2881_v25 = vor.u32 %v1986_v19, %v1737_v18  ;;  %v2944_v21 = vperm.slane %v2941_v20, 0  ;;  %s3389_s26 = sld [smem:[#allocation26_spill]]  ;;  %s1487_s3 = sshll.u32 %s3088_s7, 4  ;;  %s1488_s3 = int_to_ptr.vmem [resolvable:$true] %s1487_s3 }
  0x84   : > { %992 = vmatpush.bf16.msrb.mxu2 %v1790_v35  ;;  %v1766_v35 = vor.u32 %v1991_v32, %v1763_v33  ;;  %s1472_s14 = scalar_lea.sflag [#allocation4], %s281_s10 }
  0x85   : > { %1081 = vmatpush.bf16.msrb.mxu3 %v1886_v39  ;;  %1170 = vmatpush.bf16.msrb.mxu0 %v1794_v44  ;;  %v1862_v39 = vor.u32 %v2015_v34, %v1859_v36  ;;  %v1770_v44 = vor.u32 %v1993_v38, %v1769_v37  ;;  %s2060_s27 = smul.u32 192, %s3388_s15 }
  0x86   : > { %1259 = vmatpush.bf16.msrb.mxu1 %v1890_v47  ;;  %v1866_v47 = vor.u32 %v2017_v46, %v1865_v45 }
  0x87   : > { %s1484_s28 = sadd.s32 %s2060_s27, %s1480_s11 }
  0x88   : > { %993 = vmatpush.bf16.msrb.mxu2 %v1778_v63  ;;  %v2913_v63 = vor.u32 %v1987_v54, %v1747_v55  ;;  %s1953_s21 = sshll.u32 %s1484_s28, 2 }
  0x89   : > { %1082 = vmatpush.bf16.msrb.mxu3 %v1874_v11  ;;  %1171 = vmatpush.bf16.msrb.mxu0 %v1782_v12  ;;  %v1990_v11 = vld [vmem:[%s2667_s20 + $0xf4] sm:$0xf0]  ;;  %v1973_v12 = vld [vmem:[%s2667_s20 + $0x74] sm:$0xf]  ;;  %s1486_s18 = scalar_lea.hbm %s3389_s26, %s1953_s21  ;;  %s2315_s5 = scalar_lea.hbm %s3389_s26, 1536 }
  0x8a   : > { %1260 = vmatpush.bf16.msrb.mxu1 %v1878_v15  ;;  %v1755_v15 = vld [vmem:[%s2667_s20 + $0xf8] sm:$0xf0]  ;;  %v2929_v17 = vor.u32 %v1990_v11, %v1753_v10  ;;  %v2931_v18 = vor.u32 %v1973_v12, %v1691_v13  ;;  %s1489_s12 = sshll.u32 %s1486_s18, 4  ;;  %s1490_s12 = int_to_ptr.hbm [resolvable:$true] %s1489_s12 }
  0x8b   : > { %v2933_v19 = vor.u32 %v1989_v14, %v1755_v15  ;;  %s2309_s20 = sshra.s32 %s1490_s12, 4  ;;  %s2310_s20 = int_to_ptr.hbm [resolvable:$true] %s2309_s20 }
  0x8c   : > { %994 = vmatpush.bf16.msrb.mxu2 %v1766_v35  ;;  %s2311_s0 = scalar_lea.hbm %s2310_s20, 384  ;;  %p2316_p1 = scmp.lt.s32.totalorder %s2310_s20, %s3389_s26 }
  0x8d   : > { %1083 = vmatpush.bf16.msrb.mxu3 %v1862_v39  ;;  %1172 = vmatpush.bf16.msrb.mxu0 %v1770_v44  ;;  %p2312_p4 = scmp.ne.s32.totalorder %s2310_s20, %s2311_s0  ;;  %p2317_p3 = scmp.lt.s32.totalorder %s2315_s5, %s2311_s0 }
  0x8e   : > { %1261 = vmatpush.bf16.msrb.mxu1 %v1866_v47 }
  0x8f   : > { %827 = vmatmul.bf16.gmra.mxu0 %v2795_v0  ;;  %867 = vmatmul.bf16.gmra.mxu2 %v2797_v1  ;;  %p2313_p5 = pnand %p2312_p4, %p2636_p2  ;;  %p2318_p7 = por %p2317_p3, %p2316_p1 }
  0x90   : > { %916 = vmatmul.bf16.gmra.mxu1 %v2799_v2 }
  0x91   : > { %p2314_p8 = pneg %p2313_p5 }
  0x92   : > { %956 = vmatmul.bf16.gmra.mxu3 %v2801_v5 }
  0x93   : > { %p2319_p9 = pnand %p2318_p7, %p2314_p8 }
  0x9f   : > { %832 = vmatmul.bf16.gmra.mxu0 %v2823_v28  ;;  %872 = vmatmul.bf16.gmra.mxu2 %v2825_v29 }
  0xa0   : > { %921 = vmatmul.bf16.gmra.mxu1 %v2827_v30 }
  0xa2   : > { %961 = vmatmul.bf16.gmra.mxu3 %v2829_v31 }
  0xaf   : > { %837 = vmatmul.bf16.gmra.mxu0 %v2851_v56  ;;  %877 = vmatmul.bf16.gmra.mxu2 %v2853_v57 }
  0xb0   : > { %926 = vmatmul.bf16.gmra.mxu1 %v2855_v58 }
  0xb2   : > { %966 = vmatmul.bf16.gmra.mxu3 %v2857_v59 }
  0xbf   : > { %842 = vmatmul.bf16.gmra.mxu0 %v2879_v24  ;;  %882 = vmatmul.bf16.gmra.mxu2 %v2881_v25 }
  0xc0   : > { %931 = vmatmul.bf16.gmra.mxu1 %v2883_v26 }
  0xc2   : > { %971 = vmatmul.bf16.gmra.mxu3 %v2885_v27 }
  0xcf   : > { %847 = vmatmul.bf16.gmra.mxu0 %v2907_v60  ;;  %887 = vmatmul.bf16.gmra.mxu2 %v2909_v61 }
  0xd0   : > { %936 = vmatmul.bf16.gmra.mxu1 %v2911_v62 }
  0xd2   : > { %976 = vmatmul.bf16.gmra.mxu3 %v2913_v63 }
  0xdf   : > { %852 = vmatmul.bf16.gmra.mxu0 %v2927_v16  ;;  %892 = vmatmul.bf16.gmra.mxu2 %v2929_v17 }
  0xe0   : > { %941 = vmatmul.bf16.gmra.mxu1 %v2931_v18 }
  0xe2   : > { %981 = vmatmul.bf16.gmra.mxu3 %v2933_v19 }
  0xec   : > { %v818_v22 = vpop.f32.mrf.mxu0 }
  0xed   : > { %v819_v23 = vadd.f32 %v818_v22, %v2944_v21  ;;  %v907_v32 = vpop.f32.mrf.mxu1 }
  0xef   : > { %v2947_v33 = vadd.f32 %v907_v32, %v819_v23  ;;  %995 = vmatmul.bf16.vlgmr.msrb.gmra.mxu2 %v2732_v3  ;;  %1173 = vmatmul.bf16.vlgmr.msrb.gmra.mxu0 %v2732_v3 }
  0xf0   : > { %1262 = vmatmul.bf16.vlgmr.msrb.gmra.mxu1 %v2739_v8 }
  0xf2   : > { %1084 = vmatmul.bf16.vlgmr.msrb.gmra.mxu3 %v2739_v8  ;;  %v858_v34 = vpop.f32.mrf.mxu2 }
  0xf3   : > { %v859_v35 = vadd.f32 %v858_v34, %v2944_v21 }
  0xf4   : > { %v820_v37 = vpop.f32.mrf.mxu0 }
  0xf5   : > { %v947_v36 = vpop.f32.mrf.mxu3  ;;  %v821_v39 = vadd.f32 %v820_v37, %v2944_v21  ;;  %v909_v44 = vpop.f32.mrf.mxu1 }
  0xf6   : > { %v2954_v38 = vadd.f32 %v947_v36, %v859_v35 }
  0xf7   : > { %v2957_v45 = vadd.f32 %v909_v44, %v821_v39 }
  0xfa   : > { %v860_v46 = vpop.f32.mrf.mxu2 }
  0xfb   : > { %v861_v47 = vadd.f32 %v860_v46, %v2944_v21 }
  0xfc   : > { %v823_v48 = vpop.f32.mrf.mxu0 }
  0xfd   : > { %v949_v3 = vpop.f32.mrf.mxu3  ;;  %v824_v8 = vadd.f32 %v823_v48, %v2944_v21  ;;  %v912_v50 = vpop.f32.mrf.mxu1 }
  0xfe   : > { %v2960_v49 = vadd.f32 %v949_v3, %v861_v47 }
  0xff   : > { %v2963_v51 = vadd.f32 %v912_v50, %v824_v8  ;;  %1000 = vmatmul.bf16.gmra.mxu2 %v2767_v40  ;;  %1178 = vmatmul.bf16.gmra.mxu0 %v2767_v40 }
 0x100   : > { %1267 = vmatmul.bf16.gmra.mxu1 %v2771_v42 }
 0x102   : > { %1089 = vmatmul.bf16.gmra.mxu3 %v2771_v42  ;;  %v863_v52 = vpop.f32.mrf.mxu2 }
 0x103   : > { %v864_v53 = vadd.f32 %v863_v52, %v2944_v21 }
 0x104   : > { %v825_v55 = vpop.f32.mrf.mxu0 }
 0x105   : > { %v952_v54 = vpop.f32.mrf.mxu3  ;;  %v826_v7 = vadd.f32 %v825_v55, %v2944_v21  ;;  %v914_v10 = vpop.f32.mrf.mxu1 }
 0x106   : > { %v2970_v6 = vadd.f32 %v952_v54, %v864_v53 }
 0x107   : > { %v2973_v11 = vadd.f32 %v914_v10, %v826_v7 }
 0x10a   : > { %v865_v12 = vpop.f32.mrf.mxu2 }
 0x10b   : > { %v866_v13 = vadd.f32 %v865_v12, %v2944_v21 }
 0x10c   : > { %v828_v14 = vpop.f32.mrf.mxu0 }
 0x10d   : > { %v954_v40 = vpop.f32.mrf.mxu3  ;;  %v829_v42 = vadd.f32 %v828_v14, %v2944_v21  ;;  %v917_v22 = vpop.f32.mrf.mxu1 }
 0x10e   : > { %v2976_v15 = vadd.f32 %v954_v40, %v866_v13 }
 0x10f   : > { %v2979_v23 = vadd.f32 %v917_v22, %v829_v42  ;;  %1005 = vmatmul.bf16.gmra.mxu2 %v2795_v0  ;;  %1183 = vmatmul.bf16.gmra.mxu0 %v2795_v0 }
 0x110   : > { %1272 = vmatmul.bf16.gmra.mxu1 %v2799_v2 }
 0x112   : > { %1094 = vmatmul.bf16.gmra.mxu3 %v2799_v2  ;;  %v868_v32 = vpop.f32.mrf.mxu2 }
 0x113   : > { %v869_v34 = vadd.f32 %v868_v32, %v2944_v21 }
 0x114   : > { %v830_v36 = vpop.f32.mrf.mxu0 }
 0x115   : > { %v957_v35 = vpop.f32.mrf.mxu3  ;;  %v831_v39 = vadd.f32 %v830_v36, %v2944_v21  ;;  %v919_v44 = vpop.f32.mrf.mxu1 }
 0x116   : > { %v2986_v37 = vadd.f32 %v957_v35, %v869_v34 }
 0x117   : > { %v2989_v46 = vadd.f32 %v919_v44, %v831_v39 }
 0x11a   : > { %v870_v47 = vpop.f32.mrf.mxu2 }
 0x11b   : > { %v871_v3 = vadd.f32 %v870_v47, %v2944_v21 }
 0x11c   : > { %v833_v48 = vpop.f32.mrf.mxu0 }
 0x11d   : > { %v959_v0 = vpop.f32.mrf.mxu3  ;;  %v834_v2 = vadd.f32 %v833_v48, %v2944_v21  ;;  %v922_v50 = vpop.f32.mrf.mxu1 }
 0x11e   : > { %v2992_v8 = vadd.f32 %v959_v0, %v871_v3 }
 0x11f   : > { %v2995_v52 = vadd.f32 %v922_v50, %v834_v2  ;;  %1010 = vmatmul.bf16.gmra.mxu2 %v2823_v28  ;;  %1188 = vmatmul.bf16.gmra.mxu0 %v2823_v28 }
 0x120   : > { %1277 = vmatmul.bf16.gmra.mxu1 %v2827_v30 }
 0x122   : > { %1099 = vmatmul.bf16.gmra.mxu3 %v2827_v30  ;;  %v873_v53 = vpop.f32.mrf.mxu2 }
 0x123   : > { %v874_v54 = vadd.f32 %v873_v53, %v2944_v21 }
 0x124   : > { %v835_v7 = vpop.f32.mrf.mxu0 }
 0x125   : > { %v962_v55 = vpop.f32.mrf.mxu3  ;;  %v836_v12 = vadd.f32 %v835_v7, %v2944_v21  ;;  %v924_v13 = vpop.f32.mrf.mxu1 }
 0x126   : > { %v3002_v10 = vadd.f32 %v962_v55, %v874_v54 }
 0x127   : > { %v3005_v40 = vadd.f32 %v924_v13, %v836_v12 }
 0x12a   : > { %v875_v14 = vpop.f32.mrf.mxu2 }
 0x12b   : > { %v876_v42 = vadd.f32 %v875_v14, %v2944_v21 }
 0x12c   : > { %v838_v22 = vpop.f32.mrf.mxu0 }
 0x12d   : > { %v964_v28 = vpop.f32.mrf.mxu3  ;;  %v839_v30 = vadd.f32 %v838_v22, %v2944_v21  ;;  %v927_v34 = vpop.f32.mrf.mxu1 }
 0x12e   : > { %v3008_v32 = vadd.f32 %v964_v28, %v876_v42 }
 0x12f   : > { %v3011_v35 = vadd.f32 %v927_v34, %v839_v30  ;;  %1015 = vmatmul.bf16.gmra.mxu2 %v2851_v56  ;;  %1193 = vmatmul.bf16.gmra.mxu0 %v2851_v56 }
 0x130   : > { %1282 = vmatmul.bf16.gmra.mxu1 %v2855_v58 }
 0x132   : > { %1104 = vmatmul.bf16.gmra.mxu3 %v2855_v58  ;;  %v878_v36 = vpop.f32.mrf.mxu2 }
 0x133   : > { %v879_v39 = vadd.f32 %v878_v36, %v2944_v21 }
 0x134   : > { %v840_v47 = vpop.f32.mrf.mxu0 }
 0x135   : > { %v967_v44 = vpop.f32.mrf.mxu3  ;;  %v841_v0 = vadd.f32 %v840_v47, %v2944_v21  ;;  %v929_v48 = vpop.f32.mrf.mxu1 }
 0x136   : > { %v3018_v3 = vadd.f32 %v967_v44, %v879_v39 }
 0x137   : > { %v3021_v2 = vadd.f32 %v929_v48, %v841_v0 }
 0x13a   : > { %v880_v50 = vpop.f32.mrf.mxu2 }
 0x13b   : > { %v881_v53 = vadd.f32 %v880_v50, %v2944_v21 }
 0x13c   : > { %v843_v54 = vpop.f32.mrf.mxu0 }
 0x13d   : > { %v969_v56 = vpop.f32.mrf.mxu3  ;;  %v844_v58 = vadd.f32 %v843_v54, %v2944_v21  ;;  %v932_v7 = vpop.f32.mrf.mxu1 }
 0x13e   : > { %v3024_v55 = vadd.f32 %v969_v56, %v881_v53 }
 0x13f   : > { %v3027_v12 = vadd.f32 %v932_v7, %v844_v58  ;;  %1020 = vmatmul.bf16.gmra.mxu2 %v2879_v24  ;;  %1198 = vmatmul.bf16.gmra.mxu0 %v2879_v24 }
 0x140   : > { %1287 = vmatmul.bf16.gmra.mxu1 %v2883_v26 }
 0x142   : > { %1109 = vmatmul.bf16.gmra.mxu3 %v2883_v26  ;;  %v883_v13 = vpop.f32.mrf.mxu2 }
 0x143   : > { %v884_v14 = vadd.f32 %v883_v13, %v2944_v21 }
 0x144   : > { %v845_v28 = vpop.f32.mrf.mxu0 }
 0x145   : > { %v972_v42 = vpop.f32.mrf.mxu3  ;;  %v846_v30 = vadd.f32 %v845_v28, %v2944_v21  ;;  %v934_v34 = vpop.f32.mrf.mxu1 }
 0x146   : > { %v3034_v22 = vadd.f32 %v972_v42, %v884_v14 }
 0x147   : > { %v3037_v36 = vadd.f32 %v934_v34, %v846_v30 }
 0x14a   : > { %v885_v39 = vpop.f32.mrf.mxu2 }
 0x14b   : > { %v886_v44 = vadd.f32 %v885_v39, %v2944_v21 }
 0x14c   : > { %v848_v47 = vpop.f32.mrf.mxu0 }
 0x14d   : > { %v974_v24 = vpop.f32.mrf.mxu3  ;;  %v849_v26 = vadd.f32 %v848_v47, %v2944_v21  ;;  %v937_v48 = vpop.f32.mrf.mxu1 }
 0x14e   : > { %v3040_v0 = vadd.f32 %v974_v24, %v886_v44 }
 0x14f   : > { %v3043_v50 = vadd.f32 %v937_v48, %v849_v26  ;;  %1025 = vmatmul.bf16.gmra.mxu2 %v2907_v60  ;;  %1203 = vmatmul.bf16.gmra.mxu0 %v2907_v60 }
 0x150   : > { %1292 = vmatmul.bf16.gmra.mxu1 %v2911_v62 }
 0x152   : > { %1114 = vmatmul.bf16.gmra.mxu3 %v2911_v62  ;;  %v888_v53 = vpop.f32.mrf.mxu2 }
 0x153   : > { %v889_v56 = vadd.f32 %v888_v53, %v2944_v21 }
 0x154   : > { %v850_v58 = vpop.f32.mrf.mxu0 }
 0x155   : > { %v977_v54 = vpop.f32.mrf.mxu3  ;;  %v851_v13 = vadd.f32 %v850_v58, %v2944_v21  ;;  %v939_v14 = vpop.f32.mrf.mxu1 }
 0x156   : > { %v3050_v7 = vadd.f32 %v977_v54, %v889_v56 }
 0x157   : > { %v3053_v42 = vadd.f32 %v939_v14, %v851_v13  ;;  %v3072_v14 = vperm.slane %v2941_v20, 2 }
 0x15a   : > { %v890_v28 = vpop.f32.mrf.mxu2 }
 0x15b   : > { %v891_v30 = vadd.f32 %v890_v28, %v2944_v21 }
 0x15c   : > { %v853_v34 = vpop.f32.mrf.mxu0 }
 0x15d   : > { %v979_v60 = vpop.f32.mrf.mxu3  ;;  %v854_v62 = vadd.f32 %v853_v34, %v2944_v21  ;;  %v942_v44 = vpop.f32.mrf.mxu1 }
 0x15e   : > { %v3056_v39 = vadd.f32 %v979_v60, %v891_v30 }
 0x15f   : > { %v3059_v24 = vadd.f32 %v942_v44, %v854_v62  ;;  %1030 = vmatmul.bf16.gmra.mxu2 %v2927_v16  ;;  %1208 = vmatmul.bf16.gmra.mxu0 %v2927_v16 }
 0x160   : > { %1297 = vmatmul.bf16.gmra.mxu1 %v2931_v18 }
 0x162   : > { %1119 = vmatmul.bf16.gmra.mxu3 %v2931_v18  ;;  %v893_v47 = vpop.f32.mrf.mxu2 }
 0x163   : > { %v894_v26 = vadd.f32 %v893_v47, %v2944_v21  ;;  %v3084_v47 = vperm.slane %v2941_v20, 1 }
 0x164   : > { %v855_v53 = vpop.f32.mrf.mxu0 }
 0x165   : > { %v982_v48 = vpop.f32.mrf.mxu3  ;;  %v856_v54 = vadd.f32 %v855_v53, %v2944_v21  ;;  %v944_v58 = vpop.f32.mrf.mxu1 }
 0x166   : > { %v3066_v56 = vadd.f32 %v982_v48, %v894_v26 }
 0x167   : > { %v3069_v13 = vadd.f32 %v944_v58, %v856_v54 }
 0x16a   : > { %v895_v16 = vpop.f32.mrf.mxu2 }
 0x16b   : > { %v896_v28 = vadd.f32 %v895_v16, %v2944_v21 }
 0x16c   : > { %v1174_v30 = vpop.f32.mrf.mxu0 }
 0x16d   : > { %v984_v18 = vpop.f32.mrf.mxu3  ;;  %v1175_v34 = vadd.f32 %v1174_v30, %v3072_v14  ;;  %v1263_v62 = vpop.f32.mrf.mxu1 }
 0x16e   : > { %v3078_v60 = vadd.f32 %v984_v18, %v896_v28 }
 0x16f   : > { %v1264_v44 = vadd.f32 %v1263_v62, %v1175_v34  ;;  %1035 = vmatmul.bf16.gmra.mxu2 %v2734_v4  ;;  %1213 = vmatmul.bf16.gmra.mxu0 %v2734_v4 }
 0x170   : > { %1302 = vmatmul.bf16.gmra.mxu1 %v2741_v9 }
 0x171   : > { %v1344_v21 = vpack.c.bf16 %v1264_v44, %v1264_v44 }
 0x172   : > { %1124 = vmatmul.bf16.gmra.mxu3 %v2741_v9  ;;  %v996_v26 = vpop.f32.mrf.mxu2 }
 0x173   : > { %1408 = vst [vmem:[%s3088_s7 + $0x8] sm:$0xf] %v1344_v21  ;;  %v997_v48 = vadd.f32 %v996_v26, %v3084_v47 }
 0x174   : > { %v1176_v54 = vpop.f32.mrf.mxu0 }
 0x175   : > { %v1085_v53 = vpop.f32.mrf.mxu3  ;;  %v1177_v20 = vadd.f32 %v1176_v54, %v3072_v14  ;;  %v1265_v58 = vpop.f32.mrf.mxu1 }
 0x176   : > { %v1086_v4 = vadd.f32 %v1085_v53, %v997_v48 }
 0x177   : > { %v1266_v28 = vadd.f32 %v1265_v58, %v1177_v20 }
 0x178   : > { %v1343_v16 = vpack.c.bf16 %v1086_v4, %v2947_v33 }
 0x179   : > { %v1346_v9 = vpack.c.bf16 %v1266_v28, %v1266_v28 }
 0x17a   : > { %1407 = vst [vmem:[%s3088_s7] sm:$0xff] %v1343_v16  ;;  %v998_v18 = vpop.f32.mrf.mxu2 }
 0x17b   : > { %1410 = vst [vmem:[%s3088_s7 + $0x14] sm:$0xf] %v1346_v9  ;;  %v999_v30 = vadd.f32 %v998_v18, %v3084_v47 }
 0x17c   : > { %v1179_v62 = vpop.f32.mrf.mxu0 }
 0x17d   : > { %v1087_v34 = vpop.f32.mrf.mxu3  ;;  %v1180_v21 = vadd.f32 %v1179_v62, %v3072_v14  ;;  %v1268_v26 = vpop.f32.mrf.mxu1 }
 0x17e   : > { %v1088_v44 = vadd.f32 %v1087_v34, %v999_v30 }
 0x17f   : > { %v1269_v53 = vadd.f32 %v1268_v26, %v1180_v21  ;;  %1040 = vmatmul.bf16.gmra.mxu2 %v2769_v41  ;;  %1218 = vmatmul.bf16.gmra.mxu0 %v2769_v41 }
 0x180   : > { %v1345_v48 = vpack.c.bf16 %v1088_v44, %v2957_v45  ;;  %1307 = vmatmul.bf16.gmra.mxu1 %v2773_v43 }
 0x181   : > { %v1348_v33 = vpack.c.bf16 %v1269_v53, %v1269_v53 }
 0x182   : > { %1129 = vmatmul.bf16.gmra.mxu3 %v2773_v43  ;;  %1409 = vst [vmem:[%s3088_s7 + $0xc] sm:$0xff] %v1345_v48  ;;  %v1001_v54 = vpop.f32.mrf.mxu2 }
 0x183   : > { %1412 = vst [vmem:[%s3088_s7 + $0x20] sm:$0xf] %v1348_v33  ;;  %v1002_v4 = vadd.f32 %v1001_v54, %v3084_v47 }
 0x184   : > { %v1181_v58 = vpop.f32.mrf.mxu0 }
 0x185   : > { %v1090_v20 = vpop.f32.mrf.mxu3  ;;  %v1182_v16 = vadd.f32 %v1181_v58, %v3072_v14  ;;  %v1270_v28 = vpop.f32.mrf.mxu1 }
 0x186   : > { %v1091_v45 = vadd.f32 %v1090_v20, %v1002_v4 }
 0x187   : > { %v1271_v41 = vadd.f32 %v1270_v28, %v1182_v16 }
 0x188   : > { %v1347_v9 = vpack.c.bf16 %v1091_v45, %v2963_v51 }
 0x189   : > { %v1350_v18 = vpack.c.bf16 %v1271_v41, %v1271_v41 }
 0x18a   : > { %1411 = vst [vmem:[%s3088_s7 + $0x18] sm:$0xff] %v1347_v9  ;;  %v1003_v43 = vpop.f32.mrf.mxu2 }
 0x18b   : > { %1414 = vst [vmem:[%s3088_s7 + $0x2c] sm:$0xf] %v1350_v18  ;;  %v1004_v30 = vadd.f32 %v1003_v43, %v3084_v47 }
 0x18c   : > { %v1184_v62 = vpop.f32.mrf.mxu0 }
 0x18d   : > { %v1092_v34 = vpop.f32.mrf.mxu3  ;;  %v1185_v21 = vadd.f32 %v1184_v62, %v3072_v14  ;;  %v1273_v26 = vpop.f32.mrf.mxu1 }
 0x18e   : > { %v1093_v44 = vadd.f32 %v1092_v34, %v1004_v30 }
 0x18f   : > { %v1274_v53 = vadd.f32 %v1273_v26, %v1185_v21  ;;  %1045 = vmatmul.bf16.gmra.mxu2 %v2797_v1  ;;  %1223 = vmatmul.bf16.gmra.mxu0 %v2797_v1 }
 0x190   : > { %v1349_v48 = vpack.c.bf16 %v1093_v44, %v2973_v11  ;;  %1312 = vmatmul.bf16.gmra.mxu1 %v2801_v5 }
 0x191   : > { %v1352_v51 = vpack.c.bf16 %v1274_v53, %v1274_v53 }
 0x192   : > { %1134 = vmatmul.bf16.gmra.mxu3 %v2801_v5  ;;  %1413 = vst [vmem:[%s3088_s7 + $0x24] sm:$0xff] %v1349_v48  ;;  %v1006_v33 = vpop.f32.mrf.mxu2 }
 0x193   : > { %1416 = vst [vmem:[%s3088_s7 + $0x38] sm:$0xf] %v1352_v51  ;;  %v1007_v54 = vadd.f32 %v1006_v33, %v3084_v47 }
 0x194   : > { %v1186_v20 = vpop.f32.mrf.mxu0 }
 0x195   : > { %v1095_v4 = vpop.f32.mrf.mxu3  ;;  %v1187_v58 = vadd.f32 %v1186_v20, %v3072_v14  ;;  %v1275_v45 = vpop.f32.mrf.mxu1 }
 0x196   : > { %v1096_v11 = vadd.f32 %v1095_v4, %v1007_v54 }
 0x197   : > { %v1276_v1 = vadd.f32 %v1275_v45, %v1187_v58 }
 0x198   : > { %v1351_v16 = vpack.c.bf16 %v1096_v11, %v2979_v23 }
 0x199   : > { %v1354_v28 = vpack.c.bf16 %v1276_v1, %v1276_v1 }
 0x19a   : > { %1415 = vst [vmem:[%s3088_s7 + $0x30] sm:$0xff] %v1351_v16  ;;  %v1008_v5 = vpop.f32.mrf.mxu2 }
 0x19b   : > { %1418 = vst [vmem:[%s3088_s7 + $0x44] sm:$0xf] %v1354_v28  ;;  %v1009_v9 = vadd.f32 %v1008_v5, %v3084_v47 }
 0x19c   : > { %v1189_v18 = vpop.f32.mrf.mxu0 }
 0x19d   : > { %v1097_v41 = vpop.f32.mrf.mxu3  ;;  %v1190_v30 = vadd.f32 %v1189_v18, %v3072_v14  ;;  %v1278_v34 = vpop.f32.mrf.mxu1 }
 0x19e   : > { %v1098_v43 = vadd.f32 %v1097_v41, %v1009_v9 }
 0x19f   : > { %v1279_v44 = vadd.f32 %v1278_v34, %v1190_v30  ;;  %1050 = vmatmul.bf16.gmra.mxu2 %v2825_v29  ;;  %1228 = vmatmul.bf16.gmra.mxu0 %v2825_v29 }
 0x1a0   : > { %v1353_v62 = vpack.c.bf16 %v1098_v43, %v2989_v46  ;;  %1317 = vmatmul.bf16.gmra.mxu1 %v2829_v31 }
 0x1a1   : > { %v1356_v23 = vpack.c.bf16 %v1279_v44, %v1279_v44 }
 0x1a2   : > { %1139 = vmatmul.bf16.gmra.mxu3 %v2829_v31  ;;  %1417 = vst [vmem:[%s3088_s7 + $0x3c] sm:$0xff] %v1353_v62  ;;  %v1011_v21 = vpop.f32.mrf.mxu2 }
 0x1a3   : > { %1420 = vst [vmem:[%s3088_s7 + $0x50] sm:$0xf] %v1356_v23  ;;  %v1012_v26 = vadd.f32 %v1011_v21, %v3084_v47 }
 0x1a4   : > { %v1191_v53 = vpop.f32.mrf.mxu0 }
 0x1a5   : > { %v1100_v48 = vpop.f32.mrf.mxu3  ;;  %v1192_v51 = vadd.f32 %v1191_v53, %v3072_v14  ;;  %v1280_v33 = vpop.f32.mrf.mxu1 }
 0x1a6   : > { %v1101_v46 = vadd.f32 %v1100_v48, %v1012_v26 }
 0x1a7   : > { %v1281_v29 = vadd.f32 %v1280_v33, %v1192_v51 }
 0x1a8   : > { %v1355_v54 = vpack.c.bf16 %v1101_v46, %v2995_v52 }
 0x1a9   : > { %v1358_v4 = vpack.c.bf16 %v1281_v29, %v1281_v29 }
 0x1aa   : > { %1419 = vst [vmem:[%s3088_s7 + $0x48] sm:$0xff] %v1355_v54  ;;  %v1013_v31 = vpop.f32.mrf.mxu2 }
 0x1ab   : > { %1422 = vst [vmem:[%s3088_s7 + $0x5c] sm:$0xf] %v1358_v4  ;;  %v1014_v20 = vadd.f32 %v1013_v31, %v3084_v47 }
 0x1ac   : > { %v1194_v58 = vpop.f32.mrf.mxu0 }
 0x1ad   : > { %v1102_v11 = vpop.f32.mrf.mxu3  ;;  %v1195_v16 = vadd.f32 %v1194_v58, %v3072_v14  ;;  %v1283_v1 = vpop.f32.mrf.mxu1 }
 0x1ae   : > { %v1103_v45 = vadd.f32 %v1102_v11, %v1014_v20 }
 0x1af   : > { %v1284_v5 = vadd.f32 %v1283_v1, %v1195_v16  ;;  %1055 = vmatmul.bf16.gmra.mxu2 %v2853_v57  ;;  %1233 = vmatmul.bf16.gmra.mxu0 %v2853_v57 }
 0x1b0   : > { %v1357_v28 = vpack.c.bf16 %v1103_v45, %v3005_v40  ;;  %1322 = vmatmul.bf16.gmra.mxu1 %v2857_v59 }
 0x1b1   : > { %v1360_v52 = vpack.c.bf16 %v1284_v5, %v1284_v5 }
 0x1b2   : > { %1144 = vmatmul.bf16.gmra.mxu3 %v2857_v59  ;;  %1421 = vst [vmem:[%s3088_s7 + $0x54] sm:$0xff] %v1357_v28  ;;  %v1016_v9 = vpop.f32.mrf.mxu2 }
 0x1b3   : > { %1424 = vst [vmem:[%s3088_s7 + $0x68] sm:$0xf] %v1360_v52  ;;  %v1017_v41 = vadd.f32 %v1016_v9, %v3084_v47 }
 0x1b4   : > { %v1196_v43 = vpop.f32.mrf.mxu0 }
 0x1b5   : > { %v1105_v18 = vpop.f32.mrf.mxu3  ;;  %v1197_v30 = vadd.f32 %v1196_v43, %v3072_v14  ;;  %v1285_v34 = vpop.f32.mrf.mxu1 }
 0x1b6   : > { %v1106_v40 = vadd.f32 %v1105_v18, %v1017_v41 }
 0x1b7   : > { %v1286_v57 = vadd.f32 %v1285_v34, %v1197_v30 }
 0x1b8   : > { %v1359_v62 = vpack.c.bf16 %v1106_v40, %v3011_v35 }
 0x1b9   : > { %v1362_v44 = vpack.c.bf16 %v1286_v57, %v1286_v57 }
 0x1ba   : > { %1423 = vst [vmem:[%s3088_s7 + $0x60] sm:$0xff] %v1359_v62  ;;  %v1018_v59 = vpop.f32.mrf.mxu2 }
 0x1bb   : > { %1426 = vst [vmem:[%s3088_s7 + $0x74] sm:$0xf] %v1362_v44  ;;  %v1019_v23 = vadd.f32 %v1018_v59, %v3084_v47 }
 0x1bc   : > { %v1199_v26 = vpop.f32.mrf.mxu0 }
 0x1bd   : > { %v1107_v21 = vpop.f32.mrf.mxu3  ;;  %v1200_v53 = vadd.f32 %v1199_v26, %v3072_v14  ;;  %v1288_v46 = vpop.f32.mrf.mxu1 }
 0x1be   : > { %v1108_v48 = vadd.f32 %v1107_v21, %v1019_v23 }
 0x1bf   : > { %v1289_v33 = vadd.f32 %v1288_v46, %v1200_v53  ;;  %1060 = vmatmul.bf16.gmra.mxu2 %v2881_v25  ;;  %1238 = vmatmul.bf16.gmra.mxu0 %v2881_v25 }
 0x1c0   : > { %v1361_v51 = vpack.c.bf16 %v1108_v48, %v3021_v2  ;;  %1327 = vmatmul.bf16.gmra.mxu1 %v2885_v27 }
 0x1c1   : > { %v1364_v35 = vpack.c.bf16 %v1289_v33, %v1289_v33 }
 0x1c2   : > { %1149 = vmatmul.bf16.gmra.mxu3 %v2885_v27  ;;  %1425 = vst [vmem:[%s3088_s7 + $0x6c] sm:$0xff] %v1361_v51  ;;  %v1021_v54 = vpop.f32.mrf.mxu2 }
 0x1c3   : > { %1428 = vst [vmem:[%s3088_s7 + $0x80] sm:$0xf] %v1364_v35  ;;  %v1022_v29 = vadd.f32 %v1021_v54, %v3084_v47 }
 0x1c4   : > { %v1201_v31 = vpop.f32.mrf.mxu0 }
 0x1c5   : > { %v1110_v4 = vpop.f32.mrf.mxu3  ;;  %v1202_v20 = vadd.f32 %v1201_v31, %v3072_v14  ;;  %v1290_v11 = vpop.f32.mrf.mxu1 }
 0x1c6   : > { %v1111_v2 = vadd.f32 %v1110_v4, %v1022_v29 }
 0x1c7   : > { %v1291_v25 = vadd.f32 %v1290_v11, %v1202_v20 }
 0x1c8   : > { %v1363_v58 = vpack.c.bf16 %v1111_v2, %v3027_v12 }
 0x1c9   : > { %v1366_v45 = vpack.c.bf16 %v1291_v25, %v1291_v25 }
 0x1ca   : > { %1427 = vst [vmem:[%s3088_s7 + $0x78] sm:$0xff] %v1363_v58  ;;  %v1023_v27 = vpop.f32.mrf.mxu2 }
 0x1cb   : > { %1430 = vst [vmem:[%s3088_s7 + $0x8c] sm:$0xf] %v1366_v45  ;;  %v1024_v16 = vadd.f32 %v1023_v27, %v3084_v47 }
 0x1cc   : > { %v1204_v28 = vpop.f32.mrf.mxu0 }
 0x1cd   : > { %v1112_v1 = vpop.f32.mrf.mxu3  ;;  %v1205_v52 = vadd.f32 %v1204_v28, %v3072_v14  ;;  %v1293_v9 = vpop.f32.mrf.mxu1 }
 0x1ce   : > { %v1113_v5 = vadd.f32 %v1112_v1, %v1024_v16 }
 0x1cf   : > { %v1294_v18 = vadd.f32 %v1293_v9, %v1205_v52  ;;  %1065 = vmatmul.bf16.gmra.mxu2 %v2909_v61  ;;  %1243 = vmatmul.bf16.gmra.mxu0 %v2909_v61 }
 0x1d0   : > { %v1365_v41 = vpack.c.bf16 %v1113_v5, %v3037_v36  ;;  %1332 = vmatmul.bf16.gmra.mxu1 %v2913_v63 }
 0x1d1   : > { %v1368_v12 = vpack.c.bf16 %v1294_v18, %v1294_v18 }
 0x1d2   : > { %1154 = vmatmul.bf16.gmra.mxu3 %v2913_v63  ;;  %1429 = vst [vmem:[%s3088_s7 + $0x84] sm:$0xff] %v1365_v41  ;;  %v1026_v43 = vpop.f32.mrf.mxu2 }
 0x1d3   : > { %1432 = vst [vmem:[%s3088_s7 + $0x98] sm:$0xf] %v1368_v12  ;;  %v1027_v40 = vadd.f32 %v1026_v43, %v3084_v47 }
 0x1d4   : > { %v1206_v34 = vpop.f32.mrf.mxu0 }
 0x1d5   : > { %v1115_v30 = vpop.f32.mrf.mxu3  ;;  %v1207_v62 = vadd.f32 %v1206_v34, %v3072_v14  ;;  %v1295_v57 = vpop.f32.mrf.mxu1 }
 0x1d6   : > { %v1116_v36 = vadd.f32 %v1115_v30, %v1027_v40 }
 0x1d7   : > { %v1296_v61 = vadd.f32 %v1295_v57, %v1207_v62 }
 0x1d8   : > { %v1367_v44 = vpack.c.bf16 %v1116_v36, %v3043_v50 }
 0x1d9   : > { %v1370_v59 = vpack.c.bf16 %v1296_v61, %v1296_v61 }
 0x1da   : > { %1431 = vst [vmem:[%s3088_s7 + $0x90] sm:$0xff] %v1367_v44  ;;  %v1028_v63 = vpop.f32.mrf.mxu2 }
 0x1db   : > { %1434 = vst [vmem:[%s3088_s7 + $0xa4] sm:$0xf] %v1370_v59  ;;  %v1029_v23 = vadd.f32 %v1028_v63, %v3084_v47 }
 0x1dc   : > { %v1209_v26 = vpop.f32.mrf.mxu0 }
 0x1dd   : > { %v1117_v21 = vpop.f32.mrf.mxu3  ;;  %v1210_v53 = vadd.f32 %v1209_v26, %v3072_v14  ;;  %v1298_v46 = vpop.f32.mrf.mxu1 }
 0x1de   : > { %v1118_v48 = vadd.f32 %v1117_v21, %v1029_v23 }
 0x1df   : > { %v1299_v33 = vadd.f32 %v1298_v46, %v1210_v53  ;;  %1070 = vmatmul.bf16.gmra.mxu2 %v2929_v17  ;;  %1248 = vmatmul.bf16.gmra.mxu0 %v2929_v17 }
 0x1e0   : > { %v1369_v51 = vpack.c.bf16 %v1118_v48, %v3053_v42  ;;  %1337 = vmatmul.bf16.gmra.mxu1 %v2933_v19 }
 0x1e1   : > { %v1372_v50 = vpack.c.bf16 %v1299_v33, %v1299_v33 }
 0x1e2   : > { %1159 = vmatmul.bf16.gmra.mxu3 %v2933_v19  ;;  %1433 = vst [vmem:[%s3088_s7 + $0x9c] sm:$0xff] %v1369_v51  ;;  %v1031_v35 = vpop.f32.mrf.mxu2 }
 0x1e3   : > { %1436 = vst [vmem:[%s3088_s7 + $0xb0] sm:$0xf] %v1372_v50  ;;  %v1032_v54 = vadd.f32 %v1031_v35, %v3084_v47 }
 0x1e4   : > { %v1211_v4 = vpop.f32.mrf.mxu0 }
 0x1e5   : > { %v1120_v29 = vpop.f32.mrf.mxu3  ;;  %v1212_v31 = vadd.f32 %v1211_v4, %v3072_v14  ;;  %v1300_v2 = vpop.f32.mrf.mxu1 }
 0x1e6   : > { %v1121_v42 = vadd.f32 %v1120_v29, %v1032_v54 }
 0x1e7   : > { %v1301_v20 = vadd.f32 %v1300_v2, %v1212_v31 }
 0x1e8   : > { %v1371_v17 = vpack.c.bf16 %v1121_v42, %v3059_v24 }
 0x1e9   : > { %v1374_v19 = vpack.c.bf16 %v1301_v20, %v1301_v20 }
 0x1ea   : > { %1435 = vst [vmem:[%s3088_s7 + $0xa8] sm:$0xff] %v1371_v17  ;;  %v1033_v11 = vpop.f32.mrf.mxu2 }
 0x1eb   : > { %1438 = vst [vmem:[%s3088_s7 + $0xbc] sm:$0xf] %v1374_v19  ;;  %v1034_v58 = vadd.f32 %v1033_v11, %v3084_v47 }
 0x1ec   : > { %v1214_v45 = vpop.f32.mrf.mxu0 }
 0x1ed   : > { %v1122_v25 = vpop.f32.mrf.mxu3  ;;  %v1215_v16 = vadd.f32 %v1214_v45, %v3072_v14  ;;  %v1303_v1 = vpop.f32.mrf.mxu1 }
 0x1ee   : > { %v1123_v27 = vadd.f32 %v1122_v25, %v1034_v58 }
 0x1ef   : > { %v1304_v5 = vadd.f32 %v1303_v1, %v1215_v16 }
 0x1f0   : > { %v1373_v28 = vpack.c.bf16 %v1123_v27, %v3069_v13 }
 0x1f1   : > { %v1376_v24 = vpack.c.bf16 %v1304_v5, %v1304_v5 }
 0x1f2   : > { %1437 = vst [vmem:[%s3088_s7 + $0xb4] sm:$0xff] %v1373_v28  ;;  %v1036_v52 = vpop.f32.mrf.mxu2 }
 0x1f3   : > { %1440 = vst [vmem:[%s3088_s7 + $0xc8] sm:$0xf] %v1376_v24  ;;  %v1037_v9 = vadd.f32 %v1036_v52, %v3084_v47 }
 0x1f4   : > { %v1216_v18 = vpop.f32.mrf.mxu0 }
 0x1f5   : > { %v1125_v41 = vpop.f32.mrf.mxu3  ;;  %v1217_v43 = vadd.f32 %v1216_v18, %v3072_v14  ;;  %v1305_v40 = vpop.f32.mrf.mxu1 }
 0x1f6   : > { %v1126_v12 = vadd.f32 %v1125_v41, %v1037_v9 }
 0x1f7   : > { %v1306_v34 = vadd.f32 %v1305_v40, %v1217_v43 }
 0x1f8   : > { %v1375_v30 = vpack.c.bf16 %v1126_v12, %v2954_v38 }
 0x1f9   : > { %v1378_v13 = vpack.c.bf16 %v1306_v34, %v1306_v34 }
 0x1fa   : > { %1439 = vst [vmem:[%s3088_s7 + $0xc0] sm:$0xff] %v1375_v30  ;;  %v1038_v36 = vpop.f32.mrf.mxu2 }
 0x1fb   : > { %1442 = vst [vmem:[%s3088_s7 + $0xd4] sm:$0xf] %v1378_v13  ;;  %v1039_v62 = vadd.f32 %v1038_v36, %v3084_v47 }
 0x1fc   : > { %v1219_v44 = vpop.f32.mrf.mxu0 }
 0x1fd   : > { %v1127_v57 = vpop.f32.mrf.mxu3  ;;  %v1220_v59 = vadd.f32 %v1219_v44, %v3072_v14  ;;  %v1308_v63 = vpop.f32.mrf.mxu1 }
 0x1fe   : > { %v1128_v61 = vadd.f32 %v1127_v57, %v1039_v62 }
 0x1ff   : > { %v1309_v21 = vadd.f32 %v1308_v63, %v1220_v59 }
 0x200   : > { %v1377_v23 = vpack.c.bf16 %v1128_v61, %v2960_v49 }
 0x201   : > { %v1380_v38 = vpack.c.bf16 %v1309_v21, %v1309_v21 }
 0x202   : > { %1441 = vst [vmem:[%s3088_s7 + $0xcc] sm:$0xff] %v1377_v23  ;;  %v1041_v26 = vpop.f32.mrf.mxu2 }
 0x203   : > { %1444 = vst [vmem:[%s3088_s7 + $0xe0] sm:$0xf] %v1380_v38  ;;  %v1042_v48 = vadd.f32 %v1041_v26, %v3084_v47 }
 0x204   : > { %v1221_v46 = vpop.f32.mrf.mxu0 }
 0x205   : > { %v1130_v53 = vpop.f32.mrf.mxu3  ;;  %v1222_v33 = vadd.f32 %v1221_v46, %v3072_v14  ;;  %v1310_v50 = vpop.f32.mrf.mxu1 }
 0x206   : > { %v1131_v51 = vadd.f32 %v1130_v53, %v1042_v48 }
 0x207   : > { %v1311_v54 = vadd.f32 %v1310_v50, %v1222_v33 }
 0x208   : > { %v1379_v35 = vpack.c.bf16 %v1131_v51, %v2970_v6 }
 0x209   : > { %v1382_v49 = vpack.c.bf16 %v1311_v54, %v1311_v54 }
 0x20a   : > { %1443 = vst [vmem:[%s3088_s7 + $0xd8] sm:$0xff] %v1379_v35  ;;  %v1043_v29 = vpop.f32.mrf.mxu2 }
 0x20b   : > { %1446 = vst [vmem:[%s3088_s7 + $0xec] sm:$0xf] %v1382_v49  ;;  %v1044_v4 = vadd.f32 %v1043_v29, %v3084_v47 }
 0x20c   : > { %v1224_v31 = vpop.f32.mrf.mxu0 }
 0x20d   : > { %v1132_v42 = vpop.f32.mrf.mxu3  ;;  %v1225_v17 = vadd.f32 %v1224_v31, %v3072_v14  ;;  %v1313_v20 = vpop.f32.mrf.mxu1 }
 0x20e   : > { %v1133_v2 = vadd.f32 %v1132_v42, %v1044_v4 }
 0x20f   : > { %v1314_v11 = vadd.f32 %v1313_v20, %v1225_v17 }
 0x210   : > { %v1381_v19 = vpack.c.bf16 %v1133_v2, %v2976_v15 }
 0x211   : > { %v1384_v6 = vpack.c.bf16 %v1314_v11, %v1314_v11 }
 0x212   : > { %1445 = vst [vmem:[%s3088_s7 + $0xe4] sm:$0xff] %v1381_v19  ;;  %v1046_v58 = vpop.f32.mrf.mxu2 }
 0x213   : > { %1448 = vst [vmem:[%s3088_s7 + $0xf8] sm:$0xf] %v1384_v6  ;;  %v1047_v25 = vadd.f32 %v1046_v58, %v3084_v47 }
 0x214   : > { %v1226_v27 = vpop.f32.mrf.mxu0 }
 0x215   : > { %v1135_v45 = vpop.f32.mrf.mxu3  ;;  %v1227_v1 = vadd.f32 %v1226_v27, %v3072_v14  ;;  %v1315_v28 = vpop.f32.mrf.mxu1 }
 0x216   : > { %v1136_v16 = vadd.f32 %v1135_v45, %v1047_v25 }
 0x217   : > { %v1316_v24 = vadd.f32 %v1315_v28, %v1227_v1 }
 0x218   : > { %v1383_v5 = vpack.c.bf16 %v1136_v16, %v2986_v37 }
 0x219   : > { %v1386_v15 = vpack.c.bf16 %v1316_v24, %v1316_v24 }
 0x21a   : > { %1447 = vst [vmem:[%s3088_s7 + $0xf0] sm:$0xff] %v1383_v5  ;;  %v1048_v52 = vpop.f32.mrf.mxu2 }
 0x21b   : > { %1450 = vst [vmem:[%s3088_s7 + $0x104] sm:$0xf] %v1386_v15  ;;  %v1049_v9 = vadd.f32 %v1048_v52, %v3084_v47 }
 0x21c   : > { %v1229_v18 = vpop.f32.mrf.mxu0 }
 0x21d   : > { %v1137_v41 = vpop.f32.mrf.mxu3  ;;  %v1230_v43 = vadd.f32 %v1229_v18, %v3072_v14  ;;  %v1318_v40 = vpop.f32.mrf.mxu1 }
 0x21e   : > { %v1138_v12 = vadd.f32 %v1137_v41, %v1049_v9 }
 0x21f   : > { %v1319_v34 = vadd.f32 %v1318_v40, %v1230_v43 }
 0x220   : > { %v1385_v30 = vpack.c.bf16 %v1138_v12, %v2992_v8 }
 0x221   : > { %v1388_v37 = vpack.c.bf16 %v1319_v34, %v1319_v34 }
 0x222   : > { %1449 = vst [vmem:[%s3088_s7 + $0xfc] sm:$0xff] %v1385_v30  ;;  %v1051_v13 = vpop.f32.mrf.mxu2 }
 0x223   : > { %1452 = vst [vmem:[%s3088_s7 + $0x110] sm:$0xf] %v1388_v37  ;;  %v1052_v36 = vadd.f32 %v1051_v13, %v3084_v47 }
 0x224   : > { %v1231_v57 = vpop.f32.mrf.mxu0 }
 0x225   : > { %v1140_v62 = vpop.f32.mrf.mxu3  ;;  %v1232_v61 = vadd.f32 %v1231_v57, %v3072_v14  ;;  %v1320_v59 = vpop.f32.mrf.mxu1 }
 0x226   : > { %v1141_v44 = vadd.f32 %v1140_v62, %v1052_v36 }
 0x227   : > { %v1321_v23 = vadd.f32 %v1320_v59, %v1232_v61 }
 0x228   : > { %v1387_v63 = vpack.c.bf16 %v1141_v44, %v3002_v10 }
 0x229   : > { %v1390_v8 = vpack.c.bf16 %v1321_v23, %v1321_v23 }
 0x22a   : > { %1451 = vst [vmem:[%s3088_s7 + $0x108] sm:$0xff] %v1387_v63  ;;  %v1053_v21 = vpop.f32.mrf.mxu2 }
 0x22b   : > { %1454 = vst [vmem:[%s3088_s7 + $0x11c] sm:$0xf] %v1390_v8  ;;  %v1054_v38 = vadd.f32 %v1053_v21, %v3084_v47 }
 0x22c   : > { %v1234_v48 = vpop.f32.mrf.mxu0 }
 0x22d   : > { %v1142_v26 = vpop.f32.mrf.mxu3  ;;  %v1235_v46 = vadd.f32 %v1234_v48, %v3072_v14  ;;  %v1323_v51 = vpop.f32.mrf.mxu1 }
 0x22e   : > { %v1143_v53 = vadd.f32 %v1142_v26, %v1054_v38 }
 0x22f   : > { %v1324_v50 = vadd.f32 %v1323_v51, %v1235_v46 }
 0x230   : > { %v1389_v33 = vpack.c.bf16 %v1143_v53, %v3008_v32 }
 0x231   : > { %v1392_v10 = vpack.c.bf16 %v1324_v50, %v1324_v50 }
 0x232   : > { %1453 = vst [vmem:[%s3088_s7 + $0x114] sm:$0xff] %v1389_v33  ;;  %v1056_v35 = vpop.f32.mrf.mxu2 }
 0x233   : > { %1456 = vst [vmem:[%s3088_s7 + $0x128] sm:$0xf] %v1392_v10  ;;  %v1057_v54 = vadd.f32 %v1056_v35, %v3084_v47 }
 0x234   : > { %v1236_v29 = vpop.f32.mrf.mxu0 }
 0x235   : > { %v1145_v49 = vpop.f32.mrf.mxu3  ;;  %v1237_v42 = vadd.f32 %v1236_v29, %v3072_v14  ;;  %v1325_v31 = vpop.f32.mrf.mxu1 }
 0x236   : > { %v1146_v4 = vadd.f32 %v1145_v49, %v1057_v54 }
 0x237   : > { %v1326_v17 = vadd.f32 %v1325_v31, %v1237_v42 }
 0x238   : > { %v1391_v2 = vpack.c.bf16 %v1146_v4, %v3018_v3 }
 0x239   : > { %v1394_v32 = vpack.c.bf16 %v1326_v17, %v1326_v17 }
 0x23a   : > { %1455 = vst [vmem:[%s3088_s7 + $0x120] sm:$0xff] %v1391_v2  ;;  %v1058_v20 = vpop.f32.mrf.mxu2 }
 0x23b   : > { %1458 = vst [vmem:[%s3088_s7 + $0x134] sm:$0xf] %v1394_v32  ;;  %v1059_v19 = vadd.f32 %v1058_v20, %v3084_v47 }
 0x23c   : > { %v1239_v6 = vpop.f32.mrf.mxu0 }
 0x23d   : > { %v1147_v11 = vpop.f32.mrf.mxu3  ;;  %v1240_v25 = vadd.f32 %v1239_v6, %v3072_v14  ;;  %v1328_v45 = vpop.f32.mrf.mxu1 }
 0x23e   : > { %v1148_v58 = vadd.f32 %v1147_v11, %v1059_v19 }
 0x23f   : > { %v1329_v16 = vadd.f32 %v1328_v45, %v1240_v25 }
 0x240   : > { %v1393_v27 = vpack.c.bf16 %v1148_v58, %v3024_v55 }
 0x241   : > { %v1396_v3 = vpack.c.bf16 %v1329_v16, %v1329_v16 }
 0x242   : > { %1457 = vst [vmem:[%s3088_s7 + $0x12c] sm:$0xff] %v1393_v27  ;;  %v1061_v1 = vpop.f32.mrf.mxu2 }
 0x243   : > { %1460 = vst [vmem:[%s3088_s7 + $0x140] sm:$0xf] %v1396_v3  ;;  %v1062_v28 = vadd.f32 %v1061_v1, %v3084_v47 }
 0x244   : > { %v1241_v24 = vpop.f32.mrf.mxu0 }
 0x245   : > { %v1150_v5 = vpop.f32.mrf.mxu3  ;;  %v1242_v52 = vadd.f32 %v1241_v24, %v3072_v14  ;;  %v1330_v9 = vpop.f32.mrf.mxu1 }
 0x246   : > { %v1151_v15 = vadd.f32 %v1150_v5, %v1062_v28 }
 0x247   : > { %v1331_v18 = vadd.f32 %v1330_v9, %v1242_v52 }
 0x248   : > { %v1395_v41 = vpack.c.bf16 %v1151_v15, %v3034_v22 }
 0x249   : > { %v1398_v55 = vpack.c.bf16 %v1331_v18, %v1331_v18 }
 0x24a   : > { %1459 = vst [vmem:[%s3088_s7 + $0x138] sm:$0xff] %v1395_v41  ;;  %v1063_v12 = vpop.f32.mrf.mxu2 }
 0x24b   : > { %1462 = vst [vmem:[%s3088_s7 + $0x14c] sm:$0xf] %v1398_v55  ;;  %v1064_v43 = vadd.f32 %v1063_v12, %v3084_v47 }
 0x24c   : > { %v1244_v30 = vpop.f32.mrf.mxu0 }
 0x24d   : > { %v1152_v40 = vpop.f32.mrf.mxu3  ;;  %v1245_v37 = vadd.f32 %v1244_v30, %v3072_v14  ;;  %v1333_v13 = vpop.f32.mrf.mxu1 }
 0x24e   : > { %v1153_v34 = vadd.f32 %v1152_v40, %v1064_v43 }
 0x24f   : > { %v1334_v62 = vadd.f32 %v1333_v13, %v1245_v37 }
 0x250   : > { %v1397_v36 = vpack.c.bf16 %v1153_v34, %v3040_v0 }
 0x251   : > { %v1400_v22 = vpack.c.bf16 %v1334_v62, %v1334_v62 }
 0x252   : > { %1461 = vst [vmem:[%s3088_s7 + $0x144] sm:$0xff] %v1397_v36  ;;  %v1066_v57 = vpop.f32.mrf.mxu2 }
 0x253   : > { %1464 = vst [vmem:[%s3088_s7 + $0x158] sm:$0xf] %v1400_v22  ;;  %v1067_v44 = vadd.f32 %v1066_v57, %v3084_v47 }
 0x254   : > { %v1246_v59 = vpop.f32.mrf.mxu0 }
 0x255   : > { %v1155_v61 = vpop.f32.mrf.mxu3  ;;  %v1247_v23 = vadd.f32 %v1246_v59, %v3072_v14  ;;  %v1335_v8 = vpop.f32.mrf.mxu1 }
 0x256   : > { %v1156_v63 = vadd.f32 %v1155_v61, %v1067_v44 }
 0x257   : > { %v1336_v0 = vadd.f32 %v1335_v8, %v1247_v23 }
 0x258   : > { %v1399_v21 = vpack.c.bf16 %v1156_v63, %v3050_v7 }
 0x259   : > { %v1402_v38 = vpack.c.bf16 %v1336_v0, %v1336_v0 }
 0x25a   : > { %1463 = vst [vmem:[%s3088_s7 + $0x150] sm:$0xff] %v1399_v21  ;;  %v1068_v26 = vpop.f32.mrf.mxu2 }
 0x25b   : > { %1466 = vst [vmem:[%s3088_s7 + $0x164] sm:$0xf] %v1402_v38  ;;  %v1069_v48 = vadd.f32 %v1068_v26, %v3084_v47 }
 0x25c   : > { %v1249_v46 = vpop.f32.mrf.mxu0 }
 0x25d   : > { %v1157_v53 = vpop.f32.mrf.mxu3  ;;  %v1250_v33 = vadd.f32 %v1249_v46, %v3072_v14  ;;  %v1338_v50 = vpop.f32.mrf.mxu1 }
 0x25e   : > { %v1158_v51 = vadd.f32 %v1157_v53, %v1069_v48 }
 0x25f   : > { %v1339_v7 = vadd.f32 %v1338_v50, %v1250_v33 }
 0x260   : > { %v1401_v10 = vpack.c.bf16 %v1158_v51, %v3056_v39 }
 0x261   : > { %v1404_v35 = vpack.c.bf16 %v1339_v7, %v1339_v7 }
 0x262   : > { %1465 = vst [vmem:[%s3088_s7 + $0x15c] sm:$0xff] %v1401_v10  ;;  %v1071_v54 = vpop.f32.mrf.mxu2 }
 0x263   : > { %1468 = vst [vmem:[%s3088_s7 + $0x170] sm:$0xf] %v1404_v35  ;;  %v1072_v49 = vadd.f32 %v1071_v54, %v3084_v47 }
 0x264   : > { %v1251_v4 = vpop.f32.mrf.mxu0 }
 0x265   : > { %v1160_v29 = vpop.f32.mrf.mxu3  ;;  %v1252_v31 = vadd.f32 %v1251_v4, %v3072_v14  ;;  %v1340_v2 = vpop.f32.mrf.mxu1 }
 0x266   : > { %v1161_v42 = vadd.f32 %v1160_v29, %v1072_v49 }
 0x267   : > { %v1341_v17 = vadd.f32 %v1340_v2, %v1252_v31 }
 0x268   : > { %v1403_v39 = vpack.c.bf16 %v1161_v42, %v3066_v56 }
 0x269   : > { %v1406_v32 = vpack.c.bf16 %v1341_v17, %v1341_v17 }
 0x26a   : > { %1467 = vst [vmem:[%s3088_s7 + $0x168] sm:$0xff] %v1403_v39  ;;  %v1073_v20 = vpop.f32.mrf.mxu2 }
 0x26b   : > { %1470 = vst [vmem:[%s3088_s7 + $0x17c] sm:$0xf] %v1406_v32  ;;  %v1074_v19 = vadd.f32 %v1073_v20, %v3084_v47 }
 0x26d   : > { %v1162_v14 = vpop.f32.mrf.mxu3 }
 0x26e   : > { %v1163_v11 = vadd.f32 %v1162_v14, %v1074_v19 }
 0x270   : > { %v1405_v56 = vpack.c.bf16 %v1163_v11, %v3078_v60 }
 0x272   : > { %1469 = vst [vmem:[%s3088_s7 + $0x174] sm:$0xff] %v1405_v56 }
 0x273   : > { %2322 = shalt.err (!%p2319_p9)
}
 0x274   : > { %s2452_s9 = smov 192   ;;  %s2453_s10 = smov 384  }
 0x275   : > { %s2454_s6 = smov 12  }
 0x276   : > { %2067 = dma.vmem_to_hbm [thread:$0]  (%p2636_p2), %s1488_s3, 6144, %s1490_s12, %s1472_s14, %s2452_s9, %s2453_s10, %s2454_s6  }
 0x277 PF: > { %s3391_s7 = sld [smem:[#allocation12_spill]]  ;;  %p2084_p10 = scmp.ge.s32.totalorder %s2445_s25, 2 }
 0x279   : > { %p2080_p11 = pnand %p2084_p10, %p2643_p6 }
 0x27b   : > { %p2081_p12 = pneg %p2080_p11 }
 0x27d   : > { %s1504_s11 = sand.u32 1, %s3391_s7  }
 0x27e   : > { %s1505_s27 = scalar_lea.sflag [#allocation4], %s1504_s11 }
 0x27f   : > { %2388 = dma.done.wait (%p2081_p12), %s1505_s27, 6144  }
 0x280   : > { %2390 = vsyncadd (%p2081_p12), %s1505_s27, 4294961152  ;;  %s22_s25 = sadd.s32 1, %s2445_s25   ;;  %s3394_s21 = sld [smem:[#allocation13_spill]] }
 0x281   : > { %p3300_p13 = scmp.ge.s32.totalorder %s22_s25, 6   ;;  %s3395_s14 = sld [smem:[#allocation21_spill]] }
 0x282   : > { %s3396_s1 = sld [smem:[#allocation19_spill]]  ;;  %s3402_s12 = smov %s2397_s13 }
 0x283   : > { %s3397_s4 = sld [smem:[#allocation14_spill]]  ;;  %s3404_s15 = smov %s2409_s16 }
 0x284   : > { %s3398_s20 = sld [smem:[#allocation20_spill]]  ;;  %s3405_s16 = smov %s2413_s17 }
 0x285   : > { %s3399_s22 = sld [smem:[#allocation16_spill]]  ;;  %s3407_s18 = smov %s2421_s19 }
 0x286   : > { %s3400_s3 = sld [smem:[#allocation17_spill]]  ;;  %s3403_s13 = smov %s3394_s21 }
 0x287   : > { %s3401_s24 = sld [smem:[#allocation18_spill]]  ;;  %s3409_s21 = smov %s2437_s23 }
 0x288   : > { %s3406_s17 = smov %s3396_s1  ;;  %21 = sbr.rel (!%p3300_p13) target bundleno = 16 (0x10), region = 101 }
 0x289   : > { %s3408_s19 = smov %s3397_s4 }
 0x28c   : > { %s3410_s23 = smov %s3400_s3 }
 0x28d   :  { %1511 = vsyncpa [#allocation3], 1 }
 0x28e   :  { %1513 = vsyncpa [#allocation3 + $0x1], 1 }
 0x28f   :  { %1514 = vsyncpa [#allocation6], 1 }
 0x290   :  { %1516 = vsyncpa [#allocation6 + $0x1], 1 }
 0x291   :  { %1517 = vsyncpa [#allocation4], 1 }
 0x292   :  { %1519 = vsyncpa [#allocation4 + $0x1], 1 }

</bundles_post_ra>
